<compile_context>
chip_gen: v7x
topology: tpu7x:2x2x1
jax: 0.10.0
libtpu: 0.0.40
codegen_flags: <defaults>
</compile_context>

<pallas_src>
import functools

import jax
import jax.numpy as jnp
from jax.experimental import pallas as pl
from jax.experimental.pallas import tpu as pltpu

N_HIDDEN = 15   # PyTorch hidden size
HP = 16         # lane-aligned padded hidden size (4*HP = 64, 8*HP = 128)


def _gates_to_hc(gates, c, hp):
    """gates: (B, 4*hp) in order (i, f, o, g); returns new (h, c).

    Full-vreg sigmoid/tanh (two whole-vreg EUP pushes), slices taken from the
    results — avoids pre-EUP lane-extract/relayout on the critical path.
    """
    sig = jax.nn.sigmoid(gates)
    th = jnp.tanh(gates)
    i = sig[:, 0:hp]
    f = sig[:, hp:2 * hp]
    o = sig[:, 2 * hp:3 * hp]
    g = th[:, 3 * hp:4 * hp]
    c_new = f * c + i * g
    h_new = o * jnp.tanh(c_new)
    return h_new, c_new


def _seq_kernel(x_ref, w_ih1_ref, w_rec_obs_ref, w_rec_roll_ref, w_ih2_ref,
                b1_ref, b1_roll_ref, b2_ref, w_lin_ref, b_lin_ref, out_ref,
                *, seq_len, future, hp):
    bb = x_ref.shape[0]                       # per-block batch rows

    w_ih1 = w_ih1_ref[...]                    # (1, 4hp)  layer-1 input row
    w_rec_obs = w_rec_obs_ref[...]            # (2hp, 8hp) blockdiag(w_hh1, w_hh2)
    w_rec_roll = w_rec_roll_ref[...]          # (2hp, 8hp) + folded linear head
    w_ih2 = w_ih2_ref[...]                    # (hp, 4hp)
    w_lin = w_lin_ref[...]                    # (1, hp)

    # Hoisted bias broadcasts (JAX does not CSE broadcast_in_dim inside loops).
    b1 = jnp.broadcast_to(b1_ref[...], (bb, 4 * hp))
    b1_roll = jnp.broadcast_to(b1_roll_ref[...], (bb, 4 * hp))
    b2 = jnp.broadcast_to(b2_ref[...], (bb, 4 * hp))
    b_lin = jnp.broadcast_to(b_lin_ref[...], (bb, 1))

    x = x_ref[...]                            # (bb, seq_len)

    # State-independent layer-1 input contributions, hoisted out of the loop.
    xg = [x[:, t:t + 1] * w_ih1 for t in range(seq_len)]   # each (bb, 4hp)

    hh = jnp.zeros((bb, 2 * hp), jnp.float32)               # [h1 | h2]
    c1 = jnp.zeros((bb, hp), jnp.float32)
    c2 = jnp.zeros((bb, hp), jnp.float32)

    def step(w_rec, b1_cur, hh, c1, c2, in_gates1=None):
        # One block-diagonal MXU dot for ALL state-only recurrent terms.
        rec = jnp.dot(hh, w_rec, preferred_element_type=jnp.float32)  # (bb, 8hp)
        gates1 = rec[:, 0:4 * hp] + b1_cur
        if in_gates1 is not None:
            gates1 = gates1 + in_gates1
        h1, c1 = _gates_to_hc(gates1, c1, hp)
        # Only dependent dot on the critical path: h1_t @ w_ih2.
        gates2 = (jnp.dot(h1, w_ih2, preferred_element_type=jnp.float32)
                  + rec[:, 4 * hp:8 * hp] + b2)
        h2, c2 = _gates_to_hc(gates2, c2, hp)
        # Linear head (N=1): VPU multiply + lane reduce; only feeds the output
        # write (never the recurrence — rollout uses the folded weights).
        out_t = jnp.sum(h2 * w_lin, axis=1, keepdims=True) + b_lin
        hh = jnp.concatenate([h1, h2], axis=1)               # step-tail concat
        return out_t, hh, c1, c2

    outs = []

    # Observed part of the sequence (fully unrolled; static slices).
    for t in range(seq_len):
        out_t, hh, c1, c2 = step(w_rec_obs, b1, hh, c1, c2, in_gates1=xg[t])
        outs.append(out_t)

    # Autoregressive future rollout; linear head algebraically folded into the
    # block-diagonal recurrent dot, so no extra work on the serial chain.
    for _ in range(future):
        out_t, hh, c1, c2 = step(w_rec_roll, b1_roll, hh, c1, c2)
        outs.append(out_t)

    # Single lane-dense store instead of T+future masked 1-lane stores.
    out_ref[...] = jnp.concatenate(outs, axis=1)


def sequence_one_channel(x, packed, future=0):
    """x: (batch, seq) float32  ->  (batch, seq + future) float32."""
    B, T = x.shape
    x = x.astype(jnp.float32)

    # Batch-blocked grid: blocks of 8 sublanes, sharded across TCs (v7x).
    bb = 8 if (B >= 8 and B % 8 == 0) else B
    grid = (B // bb,)

    kern = functools.partial(_seq_kernel, seq_len=T, future=future, hp=HP)

    weight_names = ("w_ih1", "w_rec_obs", "w_rec_roll", "w_ih2",
                    "b1", "b1_roll", "b2", "w_lin", "b_lin")

    in_specs = [pl.BlockSpec((bb, T), lambda i: (i, 0))]
    for name in weight_names:
        in_specs.append(pl.BlockSpec(packed[name].shape, lambda i: (0, 0)))

    out = pl.pallas_call(
        kern,
        out_shape=jax.ShapeDtypeStruct((B, T + future), jnp.float32),
        grid=grid,
        in_specs=in_specs,
        out_specs=pl.BlockSpec((bb, T + future), lambda i: (i, 0)),
        compiler_params=pltpu.CompilerParams(
            dimension_semantics=("parallel",)),
    )(x, *[packed[name] for name in weight_names])
    return out                                                # (B, T+future)


def init_params(key):
    """Raw PyTorch-layout params (LSTMCell default init: U(-1/sqrt(H), 1/sqrt(H)))."""
    H = N_HIDDEN
    bound = 1.0 / float(jnp.sqrt(jnp.float32(H)))
    ks = jax.random.split(key, 10)

    def u(k_, shape):
        return jax.random.uniform(k_, shape, jnp.float32, -bound, bound)

    return {
        "w_ih1": u(ks[0], (4 * H, 1)),     # PyTorch weight_ih_l: (4H, in)
        "w_hh1": u(ks[1], (4 * H, H)),
        "b_ih1": u(ks[2], (4 * H,)),
        "b_hh1": u(ks[3], (4 * H,)),
        "w_ih2": u(ks[4], (4 * H, H)),
        "w_hh2": u(ks[5], (4 * H, H)),
        "b_ih2": u(ks[6], (4 * H,)),
        "b_hh2": u(ks[7], (4 * H,)),
        "w_lin": u(ks[8], (1, H)),         # Linear(15, 1): weight (1, 15)
        "b_lin": u(ks[9], (1,)),
    }


def pack_params(raw):
    """Transpose, reorder gates (i,f,g,o)->(i,f,o,g), pad H 15->16, build the
    block-diagonal recurrent matrices and the rollout head-folded variants."""
    H, Hp = N_HIDDEN, HP

    def reorder_pad_cols(w_t):
        # w_t: (in, 4H), columns grouped PyTorch-order [i|f|g|o] -> (in, 4Hp), [i|f|o|g]
        i, f, g, o = (w_t[:, k * H:(k + 1) * H] for k in range(4))
        pad = ((0, 0), (0, Hp - H))
        return jnp.concatenate([jnp.pad(b, pad) for b in (i, f, o, g)], axis=1)

    def pad_rows(w):
        # (H, 4Hp) -> (Hp, 4Hp); padded hidden unit gets zero weight rows.
        return jnp.pad(w, ((0, Hp - H), (0, 0)))

    w_ih1 = reorder_pad_cols(raw["w_ih1"].T)                       # (1, 4Hp)
    w_hh1 = pad_rows(reorder_pad_cols(raw["w_hh1"].T))             # (Hp, 4Hp)
    b1 = reorder_pad_cols((raw["b_ih1"] + raw["b_hh1"]).reshape(1, 4 * H))

    w_ih2 = pad_rows(reorder_pad_cols(raw["w_ih2"].T))             # (Hp, 4Hp)
    w_hh2 = pad_rows(reorder_pad_cols(raw["w_hh2"].T))             # (Hp, 4Hp)
    b2 = reorder_pad_cols((raw["b_ih2"] + raw["b_hh2"]).reshape(1, 4 * H))

    w_lin = jnp.pad(raw["w_lin"], ((0, 0), (0, Hp - H)))           # (1, Hp)
    b_lin = raw["b_lin"].reshape(1, 1)                             # (1, 1)

    zeros = jnp.zeros((Hp, 4 * Hp), jnp.float32)
    # Observed phase: [h1 | h2] @ [[w_hh1, 0], [0, w_hh2]]
    w_rec_obs = jnp.concatenate(
        [jnp.concatenate([w_hh1, zeros], axis=1),
         jnp.concatenate([zeros, w_hh2], axis=1)], axis=0)         # (2Hp, 8Hp)
    # Rollout phase: linear head folded into layer-1 input.
    w_fold = w_lin.T @ w_ih1                                       # (Hp, 4Hp)
    w_rec_roll = jnp.concatenate(
        [jnp.concatenate([w_hh1, zeros], axis=1),
         jnp.concatenate([w_fold, w_hh2], axis=1)], axis=0)        # (2Hp, 8Hp)
    b1_roll = b1 + b_lin * w_ih1                                   # (1, 4Hp)

    return {"w_ih1": w_ih1, "w_rec_obs": w_rec_obs, "w_rec_roll": w_rec_roll,
            "w_ih2": w_ih2, "b1": b1, "b1_roll": b1_roll, "b2": b2,
            "w_lin": w_lin, "b_lin": b_lin}


def _reference(x, raw, future=0):
    """Pure-JAX reference of the PyTorch forward (float32, raw param layout)."""
    B, T = x.shape
    H = N_HIDDEN
    h1 = c1 = h2 = c2 = jnp.zeros((B, H), jnp.float32)
    out = jnp.zeros((B, 1), jnp.float32)

    def cell(xt, h, c, w_ih, w_hh, b_ih, b_hh):
        g = xt @ w_ih.T + h @ w_hh.T + b_ih + b_hh
        i = jax.nn.sigmoid(g[:, 0:H])
        f = jax.nn.sigmoid(g[:, H:2 * H])
        gg = jnp.tanh(g[:, 2 * H:3 * H])
        o = jax.nn.sigmoid(g[:, 3 * H:4 * H])
        c = f * c + i * gg
        return o * jnp.tanh(c), c

    outs = []
    for t in range(T + future):
        xt = x[:, t:t + 1] if t < T else out
        h1, c1 = cell(xt, h1, c1, raw["w_ih1"], raw["w_hh1"], raw["b_ih1"], raw["b_hh1"])
        h2, c2 = cell(h1, h2, c2, raw["w_ih2"], raw["w_hh2"], raw["b_ih2"], raw["b_hh2"])
        out = h2 @ raw["w_lin"].T + raw["b_lin"]
        outs.append(out)
    return jnp.concatenate(outs, axis=1)


if __name__ == "__main__":
    key = jax.random.PRNGKey(0)
    k_param, k_x = jax.random.split(key)

    raw = init_params(k_param)
    packed = pack_params(raw)

    batch, seq, future = 16, 8, 4          # batch fills sublanes; grid = (2,)
    x = jax.random.normal(k_x, (batch, seq), dtype=jnp.float32)

    y = sequence_one_channel(x, packed, future=future)
    y = jax.block_until_ready(y)

    y_ref = _reference(x, raw, future=future)
    assert y.shape == (batch, seq + future)
    assert jnp.allclose(y, y_ref, atol=2e-3, rtol=2e-3), (y, y_ref)

    print("KERNEL_OK")
</pallas_src>

<mosaic_0001>
module attributes {stable_mosaic.version = 11 : i64} {
  func.func @_seq_kernel(%arg0: i32, %arg1: memref<8x8xf32, #tpu.memory_space<vmem>>, %arg2: memref<1x64xf32, #tpu.memory_space<vmem>>, %arg3: memref<32x128xf32, #tpu.memory_space<vmem>>, %arg4: memref<32x128xf32, #tpu.memory_space<vmem>>, %arg5: memref<16x64xf32, #tpu.memory_space<vmem>>, %arg6: memref<1x64xf32, #tpu.memory_space<vmem>>, %arg7: memref<1x64xf32, #tpu.memory_space<vmem>>, %arg8: memref<1x64xf32, #tpu.memory_space<vmem>>, %arg9: memref<1x16xf32, #tpu.memory_space<vmem>>, %arg10: memref<1x1xf32, #tpu.memory_space<vmem>>, %arg11: memref<8x12xf32, #tpu.memory_space<vmem>>) attributes {dimension_semantics = [#tpu.dimension_semantics<parallel>], iteration_bounds = array<i64: 2>, scalar_prefetch = 0 : i64, scratch_operands = 0 : i64, tpu.core_type = #tpu.core_type<tc>, window_params = [{transform_indices = @transform_0, window_bounds = array<i64: 8, 8>}, {pipeline_mode = #tpu.pipeline_mode<synchronous>, transform_indices = @transform_1, window_bounds = array<i64: 1, 64>}, {pipeline_mode = #tpu.pipeline_mode<synchronous>, transform_indices = @transform_2, window_bounds = array<i64: 32, 128>}, {pipeline_mode = #tpu.pipeline_mode<synchronous>, transform_indices = @transform_3, window_bounds = array<i64: 32, 128>}, {pipeline_mode = #tpu.pipeline_mode<synchronous>, transform_indices = @transform_4, window_bounds = array<i64: 16, 64>}, {pipeline_mode = #tpu.pipeline_mode<synchronous>, transform_indices = @transform_5, window_bounds = array<i64: 1, 64>}, {pipeline_mode = #tpu.pipeline_mode<synchronous>, transform_indices = @transform_6, window_bounds = array<i64: 1, 64>}, {pipeline_mode = #tpu.pipeline_mode<synchronous>, transform_indices = @transform_7, window_bounds = array<i64: 1, 64>}, {pipeline_mode = #tpu.pipeline_mode<synchronous>, transform_indices = @transform_8, window_bounds = array<i64: 1, 16>}, {pipeline_mode = #tpu.pipeline_mode<synchronous>, transform_indices = @transform_9, window_bounds = array<i64: 1, 1>}, {transform_indices = @transform_10, window_bounds = array<i64: 8, 12>}]} {
    %c0 = arith.constant 0 : index
    %c0_0 = arith.constant 0 : index
    %0 = vector.load %arg2[%c0, %c0_0] : memref<1x64xf32, #tpu.memory_space<vmem>>, vector<1x64xf32>
    %c0_1 = arith.constant 0 : index
    %c0_2 = arith.constant 0 : index
    %1 = vector.load %arg3[%c0_1, %c0_2] : memref<32x128xf32, #tpu.memory_space<vmem>>, vector<32x128xf32>
    %c0_3 = arith.constant 0 : index
    %c0_4 = arith.constant 0 : index
    %2 = vector.load %arg4[%c0_3, %c0_4] : memref<32x128xf32, #tpu.memory_space<vmem>>, vector<32x128xf32>
    %c0_5 = arith.constant 0 : index
    %c0_6 = arith.constant 0 : index
    %3 = vector.load %arg5[%c0_5, %c0_6] : memref<16x64xf32, #tpu.memory_space<vmem>>, vector<16x64xf32>
    %c0_7 = arith.constant 0 : index
    %c0_8 = arith.constant 0 : index
    %4 = vector.load %arg9[%c0_7, %c0_8] : memref<1x16xf32, #tpu.memory_space<vmem>>, vector<1x16xf32>
    %c0_9 = arith.constant 0 : index
    %c0_10 = arith.constant 0 : index
    %5 = vector.load %arg6[%c0_9, %c0_10] : memref<1x64xf32, #tpu.memory_space<vmem>>, vector<1x64xf32>
    %6 = vector.shape_cast %5 : vector<1x64xf32> to vector<1x64xf32>
    %7 = vector.broadcast %6 : vector<1x64xf32> to vector<8x64xf32>
    %c0_11 = arith.constant 0 : index
    %c0_12 = arith.constant 0 : index
    %8 = vector.load %arg7[%c0_11, %c0_12] : memref<1x64xf32, #tpu.memory_space<vmem>>, vector<1x64xf32>
    %9 = vector.shape_cast %8 : vector<1x64xf32> to vector<1x64xf32>
    %10 = vector.broadcast %9 : vector<1x64xf32> to vector<8x64xf32>
    %c0_13 = arith.constant 0 : index
    %c0_14 = arith.constant 0 : index
    %11 = vector.load %arg8[%c0_13, %c0_14] : memref<1x64xf32, #tpu.memory_space<vmem>>, vector<1x64xf32>
    %12 = vector.shape_cast %11 : vector<1x64xf32> to vector<1x64xf32>
    %13 = vector.broadcast %12 : vector<1x64xf32> to vector<8x64xf32>
    %c0_15 = arith.constant 0 : index
    %c0_16 = arith.constant 0 : index
    %14 = vector.load %arg10[%c0_15, %c0_16] : memref<1x1xf32, #tpu.memory_space<vmem>>, vector<1x1xf32>
    %15 = vector.shape_cast %14 : vector<1x1xf32> to vector<1x1xf32>
    %16 = vector.broadcast %15 : vector<1x1xf32> to vector<8x1xf32>
    %c0_17 = arith.constant 0 : index
    %c0_18 = arith.constant 0 : index
    %17 = vector.load %arg1[%c0_17, %c0_18] : memref<8x8xf32, #tpu.memory_space<vmem>>, vector<8x8xf32>
    %18 = vector.extract_strided_slice %17 {offsets = [0, 0], sizes = [8, 1], strides = [1, 1]} : vector<8x8xf32> to vector<8x1xf32>
    %19 = vector.broadcast %18 : vector<8x1xf32> to vector<8x64xf32>
    %20 = vector.broadcast %0 : vector<1x64xf32> to vector<8x64xf32>
    %21 = arith.mulf %19, %20 : vector<8x64xf32>
    %22 = vector.extract_strided_slice %17 {offsets = [0, 1], sizes = [8, 1], strides = [1, 1]} : vector<8x8xf32> to vector<8x1xf32>
    %23 = vector.broadcast %22 : vector<8x1xf32> to vector<8x64xf32>
    %24 = vector.broadcast %0 : vector<1x64xf32> to vector<8x64xf32>
    %25 = arith.mulf %23, %24 : vector<8x64xf32>
    %26 = vector.extract_strided_slice %17 {offsets = [0, 2], sizes = [8, 1], strides = [1, 1]} : vector<8x8xf32> to vector<8x1xf32>
    %27 = vector.broadcast %26 : vector<8x1xf32> to vector<8x64xf32>
    %28 = vector.broadcast %0 : vector<1x64xf32> to vector<8x64xf32>
    %29 = arith.mulf %27, %28 : vector<8x64xf32>
    %30 = vector.extract_strided_slice %17 {offsets = [0, 3], sizes = [8, 1], strides = [1, 1]} : vector<8x8xf32> to vector<8x1xf32>
    %31 = vector.broadcast %30 : vector<8x1xf32> to vector<8x64xf32>
    %32 = vector.broadcast %0 : vector<1x64xf32> to vector<8x64xf32>
    %33 = arith.mulf %31, %32 : vector<8x64xf32>
    %34 = vector.extract_strided_slice %17 {offsets = [0, 4], sizes = [8, 1], strides = [1, 1]} : vector<8x8xf32> to vector<8x1xf32>
    %35 = vector.broadcast %34 : vector<8x1xf32> to vector<8x64xf32>
    %36 = vector.broadcast %0 : vector<1x64xf32> to vector<8x64xf32>
    %37 = arith.mulf %35, %36 : vector<8x64xf32>
    %38 = vector.extract_strided_slice %17 {offsets = [0, 5], sizes = [8, 1], strides = [1, 1]} : vector<8x8xf32> to vector<8x1xf32>
    %39 = vector.broadcast %38 : vector<8x1xf32> to vector<8x64xf32>
    %40 = vector.broadcast %0 : vector<1x64xf32> to vector<8x64xf32>
    %41 = arith.mulf %39, %40 : vector<8x64xf32>
    %42 = vector.extract_strided_slice %17 {offsets = [0, 6], sizes = [8, 1], strides = [1, 1]} : vector<8x8xf32> to vector<8x1xf32>
    %43 = vector.broadcast %42 : vector<8x1xf32> to vector<8x64xf32>
    %44 = vector.broadcast %0 : vector<1x64xf32> to vector<8x64xf32>
    %45 = arith.mulf %43, %44 : vector<8x64xf32>
    %46 = vector.extract_strided_slice %17 {offsets = [0, 7], sizes = [8, 1], strides = [1, 1]} : vector<8x8xf32> to vector<8x1xf32>
    %47 = vector.broadcast %46 : vector<8x1xf32> to vector<8x64xf32>
    %48 = vector.broadcast %0 : vector<1x64xf32> to vector<8x64xf32>
    %49 = arith.mulf %47, %48 : vector<8x64xf32>
    %cst = arith.constant 0.000000e+00 : f32
    %50 = vector.broadcast %cst : f32 to vector<8x32xf32>
    %cst_19 = arith.constant 0.000000e+00 : f32
    %51 = vector.broadcast %cst_19 : f32 to vector<8x16xf32>
    %cst_20 = arith.constant 0.000000e+00 : f32
    %52 = vector.broadcast %cst_20 : f32 to vector<8x16xf32>
    %cst_21 = arith.constant dense<0.000000e+00> : vector<8x128xf32>
    %53 = tpu.matmul %50, %1, %cst_21 {dimension_numbers = #tpu.dot_dimension_numbers<[1], [0], [0], [1], [0, 0, 1, 1], [], []>} : vector<8x32xf32>, vector<32x128xf32>, vector<8x128xf32> -> vector<8x128xf32>
    %54 = vector.extract_strided_slice %53 {offsets = [0, 0], sizes = [8, 64], strides = [1, 1]} : vector<8x128xf32> to vector<8x64xf32>
    %55 = arith.addf %54, %7 : vector<8x64xf32>
    %56 = arith.addf %55, %21 : vector<8x64xf32>
    %57 = arith.negf %56 : vector<8x64xf32>
    %58 = math.exp %57 : vector<8x64xf32>
    %cst_22 = arith.constant 1.000000e+00 : f32
    %59 = vector.broadcast %cst_22 : f32 to vector<8x64xf32>
    %60 = arith.addf %59, %58 : vector<8x64xf32>
    %61 = arith.divf %59, %60 : vector<8x64xf32>
    %62 = math.tanh %56 : vector<8x64xf32>
    %63 = vector.extract_strided_slice %61 {offsets = [0, 0], sizes = [8, 16], strides = [1, 1]} : vector<8x64xf32> to vector<8x16xf32>
    %64 = vector.extract_strided_slice %61 {offsets = [0, 16], sizes = [8, 16], strides = [1, 1]} : vector<8x64xf32> to vector<8x16xf32>
    %65 = vector.extract_strided_slice %61 {offsets = [0, 32], sizes = [8, 16], strides = [1, 1]} : vector<8x64xf32> to vector<8x16xf32>
    %66 = vector.extract_strided_slice %62 {offsets = [0, 48], sizes = [8, 16], strides = [1, 1]} : vector<8x64xf32> to vector<8x16xf32>
    %67 = arith.mulf %64, %51 : vector<8x16xf32>
    %68 = arith.mulf %63, %66 : vector<8x16xf32>
    %69 = arith.addf %67, %68 : vector<8x16xf32>
    %70 = math.tanh %69 : vector<8x16xf32>
    %71 = arith.mulf %65, %70 : vector<8x16xf32>
    %cst_23 = arith.constant dense<0.000000e+00> : vector<8x64xf32>
    %72 = tpu.matmul %71, %3, %cst_23 {dimension_numbers = #tpu.dot_dimension_numbers<[1], [0], [0], [1], [0, 0, 1, 1], [], []>} : vector<8x16xf32>, vector<16x64xf32>, vector<8x64xf32> -> vector<8x64xf32>
    %73 = vector.extract_strided_slice %53 {offsets = [0, 64], sizes = [8, 64], strides = [1, 1]} : vector<8x128xf32> to vector<8x64xf32>
    %74 = arith.addf %72, %73 : vector<8x64xf32>
    %75 = arith.addf %74, %13 : vector<8x64xf32>
    %76 = arith.negf %75 : vector<8x64xf32>
    %77 = math.exp %76 : vector<8x64xf32>
    %cst_24 = arith.constant 1.000000e+00 : f32
    %78 = vector.broadcast %cst_24 : f32 to vector<8x64xf32>
    %79 = arith.addf %78, %77 : vector<8x64xf32>
    %80 = arith.divf %78, %79 : vector<8x64xf32>
    %81 = math.tanh %75 : vector<8x64xf32>
    %82 = vector.extract_strided_slice %80 {offsets = [0, 0], sizes = [8, 16], strides = [1, 1]} : vector<8x64xf32> to vector<8x16xf32>
    %83 = vector.extract_strided_slice %80 {offsets = [0, 16], sizes = [8, 16], strides = [1, 1]} : vector<8x64xf32> to vector<8x16xf32>
    %84 = vector.extract_strided_slice %80 {offsets = [0, 32], sizes = [8, 16], strides = [1, 1]} : vector<8x64xf32> to vector<8x16xf32>
    %85 = vector.extract_strided_slice %81 {offsets = [0, 48], sizes = [8, 16], strides = [1, 1]} : vector<8x64xf32> to vector<8x16xf32>
    %86 = arith.mulf %83, %52 : vector<8x16xf32>
    %87 = arith.mulf %82, %85 : vector<8x16xf32>
    %88 = arith.addf %86, %87 : vector<8x16xf32>
    %89 = math.tanh %88 : vector<8x16xf32>
    %90 = arith.mulf %84, %89 : vector<8x16xf32>
    %91 = vector.broadcast %4 : vector<1x16xf32> to vector<8x16xf32>
    %92 = arith.mulf %90, %91 : vector<8x16xf32>
    %cst_25 = arith.constant dense<0.000000e+00> : vector<8xf32>
    %93 = vector.multi_reduction <add>, %92, %cst_25 [1] : vector<8x16xf32> to vector<8xf32>
    %94 = vector.shape_cast %93 : vector<8xf32> to vector<8x1xf32>
    %95 = arith.addf %94, %16 : vector<8x1xf32>
    %96 = tpu.concatenate %71, %90 in 1 : vector<8x16xf32>, vector<8x16xf32> -> vector<8x32xf32>
    %cst_26 = arith.constant dense<0.000000e+00> : vector<8x128xf32>
    %97 = tpu.matmul %96, %1, %cst_26 {dimension_numbers = #tpu.dot_dimension_numbers<[1], [0], [0], [1], [0, 0, 1, 1], [], []>} : vector<8x32xf32>, vector<32x128xf32>, vector<8x128xf32> -> vector<8x128xf32>
    %98 = vector.extract_strided_slice %97 {offsets = [0, 0], sizes = [8, 64], strides = [1, 1]} : vector<8x128xf32> to vector<8x64xf32>
    %99 = arith.addf %98, %7 : vector<8x64xf32>
    %100 = arith.addf %99, %25 : vector<8x64xf32>
    %101 = arith.negf %100 : vector<8x64xf32>
    %102 = math.exp %101 : vector<8x64xf32>
    %cst_27 = arith.constant 1.000000e+00 : f32
    %103 = vector.broadcast %cst_27 : f32 to vector<8x64xf32>
    %104 = arith.addf %103, %102 : vector<8x64xf32>
    %105 = arith.divf %103, %104 : vector<8x64xf32>
    %106 = math.tanh %100 : vector<8x64xf32>
    %107 = vector.extract_strided_slice %105 {offsets = [0, 0], sizes = [8, 16], strides = [1, 1]} : vector<8x64xf32> to vector<8x16xf32>
    %108 = vector.extract_strided_slice %105 {offsets = [0, 16], sizes = [8, 16], strides = [1, 1]} : vector<8x64xf32> to vector<8x16xf32>
    %109 = vector.extract_strided_slice %105 {offsets = [0, 32], sizes = [8, 16], strides = [1, 1]} : vector<8x64xf32> to vector<8x16xf32>
    %110 = vector.extract_strided_slice %106 {offsets = [0, 48], sizes = [8, 16], strides = [1, 1]} : vector<8x64xf32> to vector<8x16xf32>
    %111 = arith.mulf %108, %69 : vector<8x16xf32>
    %112 = arith.mulf %107, %110 : vector<8x16xf32>
    %113 = arith.addf %111, %112 : vector<8x16xf32>
    %114 = math.tanh %113 : vector<8x16xf32>
    %115 = arith.mulf %109, %114 : vector<8x16xf32>
    %cst_28 = arith.constant dense<0.000000e+00> : vector<8x64xf32>
    %116 = tpu.matmul %115, %3, %cst_28 {dimension_numbers = #tpu.dot_dimension_numbers<[1], [0], [0], [1], [0, 0, 1, 1], [], []>} : vector<8x16xf32>, vector<16x64xf32>, vector<8x64xf32> -> vector<8x64xf32>
    %117 = vector.extract_strided_slice %97 {offsets = [0, 64], sizes = [8, 64], strides = [1, 1]} : vector<8x128xf32> to vector<8x64xf32>
    %118 = arith.addf %116, %117 : vector<8x64xf32>
    %119 = arith.addf %118, %13 : vector<8x64xf32>
    %120 = arith.negf %119 : vector<8x64xf32>
    %121 = math.exp %120 : vector<8x64xf32>
    %cst_29 = arith.constant 1.000000e+00 : f32
    %122 = vector.broadcast %cst_29 : f32 to vector<8x64xf32>
    %123 = arith.addf %122, %121 : vector<8x64xf32>
    %124 = arith.divf %122, %123 : vector<8x64xf32>
    %125 = math.tanh %119 : vector<8x64xf32>
    %126 = vector.extract_strided_slice %124 {offsets = [0, 0], sizes = [8, 16], strides = [1, 1]} : vector<8x64xf32> to vector<8x16xf32>
    %127 = vector.extract_strided_slice %124 {offsets = [0, 16], sizes = [8, 16], strides = [1, 1]} : vector<8x64xf32> to vector<8x16xf32>
    %128 = vector.extract_strided_slice %124 {offsets = [0, 32], sizes = [8, 16], strides = [1, 1]} : vector<8x64xf32> to vector<8x16xf32>
    %129 = vector.extract_strided_slice %125 {offsets = [0, 48], sizes = [8, 16], strides = [1, 1]} : vector<8x64xf32> to vector<8x16xf32>
    %130 = arith.mulf %127, %88 : vector<8x16xf32>
    %131 = arith.mulf %126, %129 : vector<8x16xf32>
    %132 = arith.addf %130, %131 : vector<8x16xf32>
    %133 = math.tanh %132 : vector<8x16xf32>
    %134 = arith.mulf %128, %133 : vector<8x16xf32>
    %135 = vector.broadcast %4 : vector<1x16xf32> to vector<8x16xf32>
    %136 = arith.mulf %134, %135 : vector<8x16xf32>
    %cst_30 = arith.constant dense<0.000000e+00> : vector<8xf32>
    %137 = vector.multi_reduction <add>, %136, %cst_30 [1] : vector<8x16xf32> to vector<8xf32>
    %138 = vector.shape_cast %137 : vector<8xf32> to vector<8x1xf32>
    %139 = arith.addf %138, %16 : vector<8x1xf32>
    %140 = tpu.concatenate %115, %134 in 1 : vector<8x16xf32>, vector<8x16xf32> -> vector<8x32xf32>
    %cst_31 = arith.constant dense<0.000000e+00> : vector<8x128xf32>
    %141 = tpu.matmul %140, %1, %cst_31 {dimension_numbers = #tpu.dot_dimension_numbers<[1], [0], [0], [1], [0, 0, 1, 1], [], []>} : vector<8x32xf32>, vector<32x128xf32>, vector<8x128xf32> -> vector<8x128xf32>
    %142 = vector.extract_strided_slice %141 {offsets = [0, 0], sizes = [8, 64], strides = [1, 1]} : vector<8x128xf32> to vector<8x64xf32>
    %143 = arith.addf %142, %7 : vector<8x64xf32>
    %144 = arith.addf %143, %29 : vector<8x64xf32>
    %145 = arith.negf %144 : vector<8x64xf32>
    %146 = math.exp %145 : vector<8x64xf32>
    %cst_32 = arith.constant 1.000000e+00 : f32
    %147 = vector.broadcast %cst_32 : f32 to vector<8x64xf32>
    %148 = arith.addf %147, %146 : vector<8x64xf32>
    %149 = arith.divf %147, %148 : vector<8x64xf32>
    %150 = math.tanh %144 : vector<8x64xf32>
    %151 = vector.extract_strided_slice %149 {offsets = [0, 0], sizes = [8, 16], strides = [1, 1]} : vector<8x64xf32> to vector<8x16xf32>
    %152 = vector.extract_strided_slice %149 {offsets = [0, 16], sizes = [8, 16], strides = [1, 1]} : vector<8x64xf32> to vector<8x16xf32>
    %153 = vector.extract_strided_slice %149 {offsets = [0, 32], sizes = [8, 16], strides = [1, 1]} : vector<8x64xf32> to vector<8x16xf32>
    %154 = vector.extract_strided_slice %150 {offsets = [0, 48], sizes = [8, 16], strides = [1, 1]} : vector<8x64xf32> to vector<8x16xf32>
    %155 = arith.mulf %152, %113 : vector<8x16xf32>
    %156 = arith.mulf %151, %154 : vector<8x16xf32>
    %157 = arith.addf %155, %156 : vector<8x16xf32>
    %158 = math.tanh %157 : vector<8x16xf32>
    %159 = arith.mulf %153, %158 : vector<8x16xf32>
    %cst_33 = arith.constant dense<0.000000e+00> : vector<8x64xf32>
    %160 = tpu.matmul %159, %3, %cst_33 {dimension_numbers = #tpu.dot_dimension_numbers<[1], [0], [0], [1], [0, 0, 1, 1], [], []>} : vector<8x16xf32>, vector<16x64xf32>, vector<8x64xf32> -> vector<8x64xf32>
    %161 = vector.extract_strided_slice %141 {offsets = [0, 64], sizes = [8, 64], strides = [1, 1]} : vector<8x128xf32> to vector<8x64xf32>
    %162 = arith.addf %160, %161 : vector<8x64xf32>
    %163 = arith.addf %162, %13 : vector<8x64xf32>
    %164 = arith.negf %163 : vector<8x64xf32>
    %165 = math.exp %164 : vector<8x64xf32>
    %cst_34 = arith.constant 1.000000e+00 : f32
    %166 = vector.broadcast %cst_34 : f32 to vector<8x64xf32>
    %167 = arith.addf %166, %165 : vector<8x64xf32>
    %168 = arith.divf %166, %167 : vector<8x64xf32>
    %169 = math.tanh %163 : vector<8x64xf32>
    %170 = vector.extract_strided_slice %168 {offsets = [0, 0], sizes = [8, 16], strides = [1, 1]} : vector<8x64xf32> to vector<8x16xf32>
    %171 = vector.extract_strided_slice %168 {offsets = [0, 16], sizes = [8, 16], strides = [1, 1]} : vector<8x64xf32> to vector<8x16xf32>
    %172 = vector.extract_strided_slice %168 {offsets = [0, 32], sizes = [8, 16], strides = [1, 1]} : vector<8x64xf32> to vector<8x16xf32>
    %173 = vector.extract_strided_slice %169 {offsets = [0, 48], sizes = [8, 16], strides = [1, 1]} : vector<8x64xf32> to vector<8x16xf32>
    %174 = arith.mulf %171, %132 : vector<8x16xf32>
    %175 = arith.mulf %170, %173 : vector<8x16xf32>
    %176 = arith.addf %174, %175 : vector<8x16xf32>
    %177 = math.tanh %176 : vector<8x16xf32>
    %178 = arith.mulf %172, %177 : vector<8x16xf32>
    %179 = vector.broadcast %4 : vector<1x16xf32> to vector<8x16xf32>
    %180 = arith.mulf %178, %179 : vector<8x16xf32>
    %cst_35 = arith.constant dense<0.000000e+00> : vector<8xf32>
    %181 = vector.multi_reduction <add>, %180, %cst_35 [1] : vector<8x16xf32> to vector<8xf32>
    %182 = vector.shape_cast %181 : vector<8xf32> to vector<8x1xf32>
    %183 = arith.addf %182, %16 : vector<8x1xf32>
    %184 = tpu.concatenate %159, %178 in 1 : vector<8x16xf32>, vector<8x16xf32> -> vector<8x32xf32>
    %cst_36 = arith.constant dense<0.000000e+00> : vector<8x128xf32>
    %185 = tpu.matmul %184, %1, %cst_36 {dimension_numbers = #tpu.dot_dimension_numbers<[1], [0], [0], [1], [0, 0, 1, 1], [], []>} : vector<8x32xf32>, vector<32x128xf32>, vector<8x128xf32> -> vector<8x128xf32>
    %186 = vector.extract_strided_slice %185 {offsets = [0, 0], sizes = [8, 64], strides = [1, 1]} : vector<8x128xf32> to vector<8x64xf32>
    %187 = arith.addf %186, %7 : vector<8x64xf32>
    %188 = arith.addf %187, %33 : vector<8x64xf32>
    %189 = arith.negf %188 : vector<8x64xf32>
    %190 = math.exp %189 : vector<8x64xf32>
    %cst_37 = arith.constant 1.000000e+00 : f32
    %191 = vector.broadcast %cst_37 : f32 to vector<8x64xf32>
    %192 = arith.addf %191, %190 : vector<8x64xf32>
    %193 = arith.divf %191, %192 : vector<8x64xf32>
    %194 = math.tanh %188 : vector<8x64xf32>
    %195 = vector.extract_strided_slice %193 {offsets = [0, 0], sizes = [8, 16], strides = [1, 1]} : vector<8x64xf32> to vector<8x16xf32>
    %196 = vector.extract_strided_slice %193 {offsets = [0, 16], sizes = [8, 16], strides = [1, 1]} : vector<8x64xf32> to vector<8x16xf32>
    %197 = vector.extract_strided_slice %193 {offsets = [0, 32], sizes = [8, 16], strides = [1, 1]} : vector<8x64xf32> to vector<8x16xf32>
    %198 = vector.extract_strided_slice %194 {offsets = [0, 48], sizes = [8, 16], strides = [1, 1]} : vector<8x64xf32> to vector<8x16xf32>
    %199 = arith.mulf %196, %157 : vector<8x16xf32>
    %200 = arith.mulf %195, %198 : vector<8x16xf32>
    %201 = arith.addf %199, %200 : vector<8x16xf32>
    %202 = math.tanh %201 : vector<8x16xf32>
    %203 = arith.mulf %197, %202 : vector<8x16xf32>
    %cst_38 = arith.constant dense<0.000000e+00> : vector<8x64xf32>
    %204 = tpu.matmul %203, %3, %cst_38 {dimension_numbers = #tpu.dot_dimension_numbers<[1], [0], [0], [1], [0, 0, 1, 1], [], []>} : vector<8x16xf32>, vector<16x64xf32>, vector<8x64xf32> -> vector<8x64xf32>
    %205 = vector.extract_strided_slice %185 {offsets = [0, 64], sizes = [8, 64], strides = [1, 1]} : vector<8x128xf32> to vector<8x64xf32>
    %206 = arith.addf %204, %205 : vector<8x64xf32>
    %207 = arith.addf %206, %13 : vector<8x64xf32>
    %208 = arith.negf %207 : vector<8x64xf32>
    %209 = math.exp %208 : vector<8x64xf32>
    %cst_39 = arith.constant 1.000000e+00 : f32
    %210 = vector.broadcast %cst_39 : f32 to vector<8x64xf32>
    %211 = arith.addf %210, %209 : vector<8x64xf32>
    %212 = arith.divf %210, %211 : vector<8x64xf32>
    %213 = math.tanh %207 : vector<8x64xf32>
    %214 = vector.extract_strided_slice %212 {offsets = [0, 0], sizes = [8, 16], strides = [1, 1]} : vector<8x64xf32> to vector<8x16xf32>
    %215 = vector.extract_strided_slice %212 {offsets = [0, 16], sizes = [8, 16], strides = [1, 1]} : vector<8x64xf32> to vector<8x16xf32>
    %216 = vector.extract_strided_slice %212 {offsets = [0, 32], sizes = [8, 16], strides = [1, 1]} : vector<8x64xf32> to vector<8x16xf32>
    %217 = vector.extract_strided_slice %213 {offsets = [0, 48], sizes = [8, 16], strides = [1, 1]} : vector<8x64xf32> to vector<8x16xf32>
    %218 = arith.mulf %215, %176 : vector<8x16xf32>
    %219 = arith.mulf %214, %217 : vector<8x16xf32>
    %220 = arith.addf %218, %219 : vector<8x16xf32>
    %221 = math.tanh %220 : vector<8x16xf32>
    %222 = arith.mulf %216, %221 : vector<8x16xf32>
    %223 = vector.broadcast %4 : vector<1x16xf32> to vector<8x16xf32>
    %224 = arith.mulf %222, %223 : vector<8x16xf32>
    %cst_40 = arith.constant dense<0.000000e+00> : vector<8xf32>
    %225 = vector.multi_reduction <add>, %224, %cst_40 [1] : vector<8x16xf32> to vector<8xf32>
    %226 = vector.shape_cast %225 : vector<8xf32> to vector<8x1xf32>
    %227 = arith.addf %226, %16 : vector<8x1xf32>
    %228 = tpu.concatenate %203, %222 in 1 : vector<8x16xf32>, vector<8x16xf32> -> vector<8x32xf32>
    %cst_41 = arith.constant dense<0.000000e+00> : vector<8x128xf32>
    %229 = tpu.matmul %228, %1, %cst_41 {dimension_numbers = #tpu.dot_dimension_numbers<[1], [0], [0], [1], [0, 0, 1, 1], [], []>} : vector<8x32xf32>, vector<32x128xf32>, vector<8x128xf32> -> vector<8x128xf32>
    %230 = vector.extract_strided_slice %229 {offsets = [0, 0], sizes = [8, 64], strides = [1, 1]} : vector<8x128xf32> to vector<8x64xf32>
    %231 = arith.addf %230, %7 : vector<8x64xf32>
    %232 = arith.addf %231, %37 : vector<8x64xf32>
    %233 = arith.negf %232 : vector<8x64xf32>
    %234 = math.exp %233 : vector<8x64xf32>
    %cst_42 = arith.constant 1.000000e+00 : f32
    %235 = vector.broadcast %cst_42 : f32 to vector<8x64xf32>
    %236 = arith.addf %235, %234 : vector<8x64xf32>
    %237 = arith.divf %235, %236 : vector<8x64xf32>
    %238 = math.tanh %232 : vector<8x64xf32>
    %239 = vector.extract_strided_slice %237 {offsets = [0, 0], sizes = [8, 16], strides = [1, 1]} : vector<8x64xf32> to vector<8x16xf32>
    %240 = vector.extract_strided_slice %237 {offsets = [0, 16], sizes = [8, 16], strides = [1, 1]} : vector<8x64xf32> to vector<8x16xf32>
    %241 = vector.extract_strided_slice %237 {offsets = [0, 32], sizes = [8, 16], strides = [1, 1]} : vector<8x64xf32> to vector<8x16xf32>
    %242 = vector.extract_strided_slice %238 {offsets = [0, 48], sizes = [8, 16], strides = [1, 1]} : vector<8x64xf32> to vector<8x16xf32>
    %243 = arith.mulf %240, %201 : vector<8x16xf32>
    %244 = arith.mulf %239, %242 : vector<8x16xf32>
    %245 = arith.addf %243, %244 : vector<8x16xf32>
    %246 = math.tanh %245 : vector<8x16xf32>
    %247 = arith.mulf %241, %246 : vector<8x16xf32>
    %cst_43 = arith.constant dense<0.000000e+00> : vector<8x64xf32>
    %248 = tpu.matmul %247, %3, %cst_43 {dimension_numbers = #tpu.dot_dimension_numbers<[1], [0], [0], [1], [0, 0, 1, 1], [], []>} : vector<8x16xf32>, vector<16x64xf32>, vector<8x64xf32> -> vector<8x64xf32>
    %249 = vector.extract_strided_slice %229 {offsets = [0, 64], sizes = [8, 64], strides = [1, 1]} : vector<8x128xf32> to vector<8x64xf32>
    %250 = arith.addf %248, %249 : vector<8x64xf32>
    %251 = arith.addf %250, %13 : vector<8x64xf32>
    %252 = arith.negf %251 : vector<8x64xf32>
    %253 = math.exp %252 : vector<8x64xf32>
    %cst_44 = arith.constant 1.000000e+00 : f32
    %254 = vector.broadcast %cst_44 : f32 to vector<8x64xf32>
    %255 = arith.addf %254, %253 : vector<8x64xf32>
    %256 = arith.divf %254, %255 : vector<8x64xf32>
    %257 = math.tanh %251 : vector<8x64xf32>
    %258 = vector.extract_strided_slice %256 {offsets = [0, 0], sizes = [8, 16], strides = [1, 1]} : vector<8x64xf32> to vector<8x16xf32>
    %259 = vector.extract_strided_slice %256 {offsets = [0, 16], sizes = [8, 16], strides = [1, 1]} : vector<8x64xf32> to vector<8x16xf32>
    %260 = vector.extract_strided_slice %256 {offsets = [0, 32], sizes = [8, 16], strides = [1, 1]} : vector<8x64xf32> to vector<8x16xf32>
    %261 = vector.extract_strided_slice %257 {offsets = [0, 48], sizes = [8, 16], strides = [1, 1]} : vector<8x64xf32> to vector<8x16xf32>
    %262 = arith.mulf %259, %220 : vector<8x16xf32>
    %263 = arith.mulf %258, %261 : vector<8x16xf32>
    %264 = arith.addf %262, %263 : vector<8x16xf32>
    %265 = math.tanh %264 : vector<8x16xf32>
    %266 = arith.mulf %260, %265 : vector<8x16xf32>
    %267 = vector.broadcast %4 : vector<1x16xf32> to vector<8x16xf32>
    %268 = arith.mulf %266, %267 : vector<8x16xf32>
    %cst_45 = arith.constant dense<0.000000e+00> : vector<8xf32>
    %269 = vector.multi_reduction <add>, %268, %cst_45 [1] : vector<8x16xf32> to vector<8xf32>
    %270 = vector.shape_cast %269 : vector<8xf32> to vector<8x1xf32>
    %271 = arith.addf %270, %16 : vector<8x1xf32>
    %272 = tpu.concatenate %247, %266 in 1 : vector<8x16xf32>, vector<8x16xf32> -> vector<8x32xf32>
    %cst_46 = arith.constant dense<0.000000e+00> : vector<8x128xf32>
    %273 = tpu.matmul %272, %1, %cst_46 {dimension_numbers = #tpu.dot_dimension_numbers<[1], [0], [0], [1], [0, 0, 1, 1], [], []>} : vector<8x32xf32>, vector<32x128xf32>, vector<8x128xf32> -> vector<8x128xf32>
    %274 = vector.extract_strided_slice %273 {offsets = [0, 0], sizes = [8, 64], strides = [1, 1]} : vector<8x128xf32> to vector<8x64xf32>
    %275 = arith.addf %274, %7 : vector<8x64xf32>
    %276 = arith.addf %275, %41 : vector<8x64xf32>
    %277 = arith.negf %276 : vector<8x64xf32>
    %278 = math.exp %277 : vector<8x64xf32>
    %cst_47 = arith.constant 1.000000e+00 : f32
    %279 = vector.broadcast %cst_47 : f32 to vector<8x64xf32>
    %280 = arith.addf %279, %278 : vector<8x64xf32>
    %281 = arith.divf %279, %280 : vector<8x64xf32>
    %282 = math.tanh %276 : vector<8x64xf32>
    %283 = vector.extract_strided_slice %281 {offsets = [0, 0], sizes = [8, 16], strides = [1, 1]} : vector<8x64xf32> to vector<8x16xf32>
    %284 = vector.extract_strided_slice %281 {offsets = [0, 16], sizes = [8, 16], strides = [1, 1]} : vector<8x64xf32> to vector<8x16xf32>
    %285 = vector.extract_strided_slice %281 {offsets = [0, 32], sizes = [8, 16], strides = [1, 1]} : vector<8x64xf32> to vector<8x16xf32>
    %286 = vector.extract_strided_slice %282 {offsets = [0, 48], sizes = [8, 16], strides = [1, 1]} : vector<8x64xf32> to vector<8x16xf32>
    %287 = arith.mulf %284, %245 : vector<8x16xf32>
    %288 = arith.mulf %283, %286 : vector<8x16xf32>
    %289 = arith.addf %287, %288 : vector<8x16xf32>
    %290 = math.tanh %289 : vector<8x16xf32>
    %291 = arith.mulf %285, %290 : vector<8x16xf32>
    %cst_48 = arith.constant dense<0.000000e+00> : vector<8x64xf32>
    %292 = tpu.matmul %291, %3, %cst_48 {dimension_numbers = #tpu.dot_dimension_numbers<[1], [0], [0], [1], [0, 0, 1, 1], [], []>} : vector<8x16xf32>, vector<16x64xf32>, vector<8x64xf32> -> vector<8x64xf32>
    %293 = vector.extract_strided_slice %273 {offsets = [0, 64], sizes = [8, 64], strides = [1, 1]} : vector<8x128xf32> to vector<8x64xf32>
    %294 = arith.addf %292, %293 : vector<8x64xf32>
    %295 = arith.addf %294, %13 : vector<8x64xf32>
    %296 = arith.negf %295 : vector<8x64xf32>
    %297 = math.exp %296 : vector<8x64xf32>
    %cst_49 = arith.constant 1.000000e+00 : f32
    %298 = vector.broadcast %cst_49 : f32 to vector<8x64xf32>
    %299 = arith.addf %298, %297 : vector<8x64xf32>
    %300 = arith.divf %298, %299 : vector<8x64xf32>
    %301 = math.tanh %295 : vector<8x64xf32>
    %302 = vector.extract_strided_slice %300 {offsets = [0, 0], sizes = [8, 16], strides = [1, 1]} : vector<8x64xf32> to vector<8x16xf32>
    %303 = vector.extract_strided_slice %300 {offsets = [0, 16], sizes = [8, 16], strides = [1, 1]} : vector<8x64xf32> to vector<8x16xf32>
    %304 = vector.extract_strided_slice %300 {offsets = [0, 32], sizes = [8, 16], strides = [1, 1]} : vector<8x64xf32> to vector<8x16xf32>
    %305 = vector.extract_strided_slice %301 {offsets = [0, 48], sizes = [8, 16], strides = [1, 1]} : vector<8x64xf32> to vector<8x16xf32>
    %306 = arith.mulf %303, %264 : vector<8x16xf32>
    %307 = arith.mulf %302, %305 : vector<8x16xf32>
    %308 = arith.addf %306, %307 : vector<8x16xf32>
    %309 = math.tanh %308 : vector<8x16xf32>
    %310 = arith.mulf %304, %309 : vector<8x16xf32>
    %311 = vector.broadcast %4 : vector<1x16xf32> to vector<8x16xf32>
    %312 = arith.mulf %310, %311 : vector<8x16xf32>
    %cst_50 = arith.constant dense<0.000000e+00> : vector<8xf32>
    %313 = vector.multi_reduction <add>, %312, %cst_50 [1] : vector<8x16xf32> to vector<8xf32>
    %314 = vector.shape_cast %313 : vector<8xf32> to vector<8x1xf32>
    %315 = arith.addf %314, %16 : vector<8x1xf32>
    %316 = tpu.concatenate %291, %310 in 1 : vector<8x16xf32>, vector<8x16xf32> -> vector<8x32xf32>
    %cst_51 = arith.constant dense<0.000000e+00> : vector<8x128xf32>
    %317 = tpu.matmul %316, %1, %cst_51 {dimension_numbers = #tpu.dot_dimension_numbers<[1], [0], [0], [1], [0, 0, 1, 1], [], []>} : vector<8x32xf32>, vector<32x128xf32>, vector<8x128xf32> -> vector<8x128xf32>
    %318 = vector.extract_strided_slice %317 {offsets = [0, 0], sizes = [8, 64], strides = [1, 1]} : vector<8x128xf32> to vector<8x64xf32>
    %319 = arith.addf %318, %7 : vector<8x64xf32>
    %320 = arith.addf %319, %45 : vector<8x64xf32>
    %321 = arith.negf %320 : vector<8x64xf32>
    %322 = math.exp %321 : vector<8x64xf32>
    %cst_52 = arith.constant 1.000000e+00 : f32
    %323 = vector.broadcast %cst_52 : f32 to vector<8x64xf32>
    %324 = arith.addf %323, %322 : vector<8x64xf32>
    %325 = arith.divf %323, %324 : vector<8x64xf32>
    %326 = math.tanh %320 : vector<8x64xf32>
    %327 = vector.extract_strided_slice %325 {offsets = [0, 0], sizes = [8, 16], strides = [1, 1]} : vector<8x64xf32> to vector<8x16xf32>
    %328 = vector.extract_strided_slice %325 {offsets = [0, 16], sizes = [8, 16], strides = [1, 1]} : vector<8x64xf32> to vector<8x16xf32>
    %329 = vector.extract_strided_slice %325 {offsets = [0, 32], sizes = [8, 16], strides = [1, 1]} : vector<8x64xf32> to vector<8x16xf32>
    %330 = vector.extract_strided_slice %326 {offsets = [0, 48], sizes = [8, 16], strides = [1, 1]} : vector<8x64xf32> to vector<8x16xf32>
    %331 = arith.mulf %328, %289 : vector<8x16xf32>
    %332 = arith.mulf %327, %330 : vector<8x16xf32>
    %333 = arith.addf %331, %332 : vector<8x16xf32>
    %334 = math.tanh %333 : vector<8x16xf32>
    %335 = arith.mulf %329, %334 : vector<8x16xf32>
    %cst_53 = arith.constant dense<0.000000e+00> : vector<8x64xf32>
    %336 = tpu.matmul %335, %3, %cst_53 {dimension_numbers = #tpu.dot_dimension_numbers<[1], [0], [0], [1], [0, 0, 1, 1], [], []>} : vector<8x16xf32>, vector<16x64xf32>, vector<8x64xf32> -> vector<8x64xf32>
    %337 = vector.extract_strided_slice %317 {offsets = [0, 64], sizes = [8, 64], strides = [1, 1]} : vector<8x128xf32> to vector<8x64xf32>
    %338 = arith.addf %336, %337 : vector<8x64xf32>
    %339 = arith.addf %338, %13 : vector<8x64xf32>
    %340 = arith.negf %339 : vector<8x64xf32>
    %341 = math.exp %340 : vector<8x64xf32>
    %cst_54 = arith.constant 1.000000e+00 : f32
    %342 = vector.broadcast %cst_54 : f32 to vector<8x64xf32>
    %343 = arith.addf %342, %341 : vector<8x64xf32>
    %344 = arith.divf %342, %343 : vector<8x64xf32>
    %345 = math.tanh %339 : vector<8x64xf32>
    %346 = vector.extract_strided_slice %344 {offsets = [0, 0], sizes = [8, 16], strides = [1, 1]} : vector<8x64xf32> to vector<8x16xf32>
    %347 = vector.extract_strided_slice %344 {offsets = [0, 16], sizes = [8, 16], strides = [1, 1]} : vector<8x64xf32> to vector<8x16xf32>
    %348 = vector.extract_strided_slice %344 {offsets = [0, 32], sizes = [8, 16], strides = [1, 1]} : vector<8x64xf32> to vector<8x16xf32>
    %349 = vector.extract_strided_slice %345 {offsets = [0, 48], sizes = [8, 16], strides = [1, 1]} : vector<8x64xf32> to vector<8x16xf32>
    %350 = arith.mulf %347, %308 : vector<8x16xf32>
    %351 = arith.mulf %346, %349 : vector<8x16xf32>
    %352 = arith.addf %350, %351 : vector<8x16xf32>
    %353 = math.tanh %352 : vector<8x16xf32>
    %354 = arith.mulf %348, %353 : vector<8x16xf32>
    %355 = vector.broadcast %4 : vector<1x16xf32> to vector<8x16xf32>
    %356 = arith.mulf %354, %355 : vector<8x16xf32>
    %cst_55 = arith.constant dense<0.000000e+00> : vector<8xf32>
    %357 = vector.multi_reduction <add>, %356, %cst_55 [1] : vector<8x16xf32> to vector<8xf32>
    %358 = vector.shape_cast %357 : vector<8xf32> to vector<8x1xf32>
    %359 = arith.addf %358, %16 : vector<8x1xf32>
    %360 = tpu.concatenate %335, %354 in 1 : vector<8x16xf32>, vector<8x16xf32> -> vector<8x32xf32>
    %cst_56 = arith.constant dense<0.000000e+00> : vector<8x128xf32>
    %361 = tpu.matmul %360, %1, %cst_56 {dimension_numbers = #tpu.dot_dimension_numbers<[1], [0], [0], [1], [0, 0, 1, 1], [], []>} : vector<8x32xf32>, vector<32x128xf32>, vector<8x128xf32> -> vector<8x128xf32>
    %362 = vector.extract_strided_slice %361 {offsets = [0, 0], sizes = [8, 64], strides = [1, 1]} : vector<8x128xf32> to vector<8x64xf32>
    %363 = arith.addf %362, %7 : vector<8x64xf32>
    %364 = arith.addf %363, %49 : vector<8x64xf32>
    %365 = arith.negf %364 : vector<8x64xf32>
    %366 = math.exp %365 : vector<8x64xf32>
    %cst_57 = arith.constant 1.000000e+00 : f32
    %367 = vector.broadcast %cst_57 : f32 to vector<8x64xf32>
    %368 = arith.addf %367, %366 : vector<8x64xf32>
    %369 = arith.divf %367, %368 : vector<8x64xf32>
    %370 = math.tanh %364 : vector<8x64xf32>
    %371 = vector.extract_strided_slice %369 {offsets = [0, 0], sizes = [8, 16], strides = [1, 1]} : vector<8x64xf32> to vector<8x16xf32>
    %372 = vector.extract_strided_slice %369 {offsets = [0, 16], sizes = [8, 16], strides = [1, 1]} : vector<8x64xf32> to vector<8x16xf32>
    %373 = vector.extract_strided_slice %369 {offsets = [0, 32], sizes = [8, 16], strides = [1, 1]} : vector<8x64xf32> to vector<8x16xf32>
    %374 = vector.extract_strided_slice %370 {offsets = [0, 48], sizes = [8, 16], strides = [1, 1]} : vector<8x64xf32> to vector<8x16xf32>
    %375 = arith.mulf %372, %333 : vector<8x16xf32>
    %376 = arith.mulf %371, %374 : vector<8x16xf32>
    %377 = arith.addf %375, %376 : vector<8x16xf32>
    %378 = math.tanh %377 : vector<8x16xf32>
    %379 = arith.mulf %373, %378 : vector<8x16xf32>
    %cst_58 = arith.constant dense<0.000000e+00> : vector<8x64xf32>
    %380 = tpu.matmul %379, %3, %cst_58 {dimension_numbers = #tpu.dot_dimension_numbers<[1], [0], [0], [1], [0, 0, 1, 1], [], []>} : vector<8x16xf32>, vector<16x64xf32>, vector<8x64xf32> -> vector<8x64xf32>
    %381 = vector.extract_strided_slice %361 {offsets = [0, 64], sizes = [8, 64], strides = [1, 1]} : vector<8x128xf32> to vector<8x64xf32>
    %382 = arith.addf %380, %381 : vector<8x64xf32>
    %383 = arith.addf %382, %13 : vector<8x64xf32>
    %384 = arith.negf %383 : vector<8x64xf32>
    %385 = math.exp %384 : vector<8x64xf32>
    %cst_59 = arith.constant 1.000000e+00 : f32
    %386 = vector.broadcast %cst_59 : f32 to vector<8x64xf32>
    %387 = arith.addf %386, %385 : vector<8x64xf32>
    %388 = arith.divf %386, %387 : vector<8x64xf32>
    %389 = math.tanh %383 : vector<8x64xf32>
    %390 = vector.extract_strided_slice %388 {offsets = [0, 0], sizes = [8, 16], strides = [1, 1]} : vector<8x64xf32> to vector<8x16xf32>
    %391 = vector.extract_strided_slice %388 {offsets = [0, 16], sizes = [8, 16], strides = [1, 1]} : vector<8x64xf32> to vector<8x16xf32>
    %392 = vector.extract_strided_slice %388 {offsets = [0, 32], sizes = [8, 16], strides = [1, 1]} : vector<8x64xf32> to vector<8x16xf32>
    %393 = vector.extract_strided_slice %389 {offsets = [0, 48], sizes = [8, 16], strides = [1, 1]} : vector<8x64xf32> to vector<8x16xf32>
    %394 = arith.mulf %391, %352 : vector<8x16xf32>
    %395 = arith.mulf %390, %393 : vector<8x16xf32>
    %396 = arith.addf %394, %395 : vector<8x16xf32>
    %397 = math.tanh %396 : vector<8x16xf32>
    %398 = arith.mulf %392, %397 : vector<8x16xf32>
    %399 = vector.broadcast %4 : vector<1x16xf32> to vector<8x16xf32>
    %400 = arith.mulf %398, %399 : vector<8x16xf32>
    %cst_60 = arith.constant dense<0.000000e+00> : vector<8xf32>
    %401 = vector.multi_reduction <add>, %400, %cst_60 [1] : vector<8x16xf32> to vector<8xf32>
    %402 = vector.shape_cast %401 : vector<8xf32> to vector<8x1xf32>
    %403 = arith.addf %402, %16 : vector<8x1xf32>
    %404 = tpu.concatenate %379, %398 in 1 : vector<8x16xf32>, vector<8x16xf32> -> vector<8x32xf32>
    %cst_61 = arith.constant dense<0.000000e+00> : vector<8x128xf32>
    %405 = tpu.matmul %404, %2, %cst_61 {dimension_numbers = #tpu.dot_dimension_numbers<[1], [0], [0], [1], [0, 0, 1, 1], [], []>} : vector<8x32xf32>, vector<32x128xf32>, vector<8x128xf32> -> vector<8x128xf32>
    %406 = vector.extract_strided_slice %405 {offsets = [0, 0], sizes = [8, 64], strides = [1, 1]} : vector<8x128xf32> to vector<8x64xf32>
    %407 = arith.addf %406, %10 : vector<8x64xf32>
    %408 = arith.negf %407 : vector<8x64xf32>
    %409 = math.exp %408 : vector<8x64xf32>
    %cst_62 = arith.constant 1.000000e+00 : f32
    %410 = vector.broadcast %cst_62 : f32 to vector<8x64xf32>
    %411 = arith.addf %410, %409 : vector<8x64xf32>
    %412 = arith.divf %410, %411 : vector<8x64xf32>
    %413 = math.tanh %407 : vector<8x64xf32>
    %414 = vector.extract_strided_slice %412 {offsets = [0, 0], sizes = [8, 16], strides = [1, 1]} : vector<8x64xf32> to vector<8x16xf32>
    %415 = vector.extract_strided_slice %412 {offsets = [0, 16], sizes = [8, 16], strides = [1, 1]} : vector<8x64xf32> to vector<8x16xf32>
    %416 = vector.extract_strided_slice %412 {offsets = [0, 32], sizes = [8, 16], strides = [1, 1]} : vector<8x64xf32> to vector<8x16xf32>
    %417 = vector.extract_strided_slice %413 {offsets = [0, 48], sizes = [8, 16], strides = [1, 1]} : vector<8x64xf32> to vector<8x16xf32>
    %418 = arith.mulf %415, %377 : vector<8x16xf32>
    %419 = arith.mulf %414, %417 : vector<8x16xf32>
    %420 = arith.addf %418, %419 : vector<8x16xf32>
    %421 = math.tanh %420 : vector<8x16xf32>
    %422 = arith.mulf %416, %421 : vector<8x16xf32>
    %cst_63 = arith.constant dense<0.000000e+00> : vector<8x64xf32>
    %423 = tpu.matmul %422, %3, %cst_63 {dimension_numbers = #tpu.dot_dimension_numbers<[1], [0], [0], [1], [0, 0, 1, 1], [], []>} : vector<8x16xf32>, vector<16x64xf32>, vector<8x64xf32> -> vector<8x64xf32>
    %424 = vector.extract_strided_slice %405 {offsets = [0, 64], sizes = [8, 64], strides = [1, 1]} : vector<8x128xf32> to vector<8x64xf32>
    %425 = arith.addf %423, %424 : vector<8x64xf32>
    %426 = arith.addf %425, %13 : vector<8x64xf32>
    %427 = arith.negf %426 : vector<8x64xf32>
    %428 = math.exp %427 : vector<8x64xf32>
    %cst_64 = arith.constant 1.000000e+00 : f32
    %429 = vector.broadcast %cst_64 : f32 to vector<8x64xf32>
    %430 = arith.addf %429, %428 : vector<8x64xf32>
    %431 = arith.divf %429, %430 : vector<8x64xf32>
    %432 = math.tanh %426 : vector<8x64xf32>
    %433 = vector.extract_strided_slice %431 {offsets = [0, 0], sizes = [8, 16], strides = [1, 1]} : vector<8x64xf32> to vector<8x16xf32>
    %434 = vector.extract_strided_slice %431 {offsets = [0, 16], sizes = [8, 16], strides = [1, 1]} : vector<8x64xf32> to vector<8x16xf32>
    %435 = vector.extract_strided_slice %431 {offsets = [0, 32], sizes = [8, 16], strides = [1, 1]} : vector<8x64xf32> to vector<8x16xf32>
    %436 = vector.extract_strided_slice %432 {offsets = [0, 48], sizes = [8, 16], strides = [1, 1]} : vector<8x64xf32> to vector<8x16xf32>
    %437 = arith.mulf %434, %396 : vector<8x16xf32>
    %438 = arith.mulf %433, %436 : vector<8x16xf32>
    %439 = arith.addf %437, %438 : vector<8x16xf32>
    %440 = math.tanh %439 : vector<8x16xf32>
    %441 = arith.mulf %435, %440 : vector<8x16xf32>
    %442 = vector.broadcast %4 : vector<1x16xf32> to vector<8x16xf32>
    %443 = arith.mulf %441, %442 : vector<8x16xf32>
    %cst_65 = arith.constant dense<0.000000e+00> : vector<8xf32>
    %444 = vector.multi_reduction <add>, %443, %cst_65 [1] : vector<8x16xf32> to vector<8xf32>
    %445 = vector.shape_cast %444 : vector<8xf32> to vector<8x1xf32>
    %446 = arith.addf %445, %16 : vector<8x1xf32>
    %447 = tpu.concatenate %422, %441 in 1 : vector<8x16xf32>, vector<8x16xf32> -> vector<8x32xf32>
    %cst_66 = arith.constant dense<0.000000e+00> : vector<8x128xf32>
    %448 = tpu.matmul %447, %2, %cst_66 {dimension_numbers = #tpu.dot_dimension_numbers<[1], [0], [0], [1], [0, 0, 1, 1], [], []>} : vector<8x32xf32>, vector<32x128xf32>, vector<8x128xf32> -> vector<8x128xf32>
    %449 = vector.extract_strided_slice %448 {offsets = [0, 0], sizes = [8, 64], strides = [1, 1]} : vector<8x128xf32> to vector<8x64xf32>
    %450 = arith.addf %449, %10 : vector<8x64xf32>
    %451 = arith.negf %450 : vector<8x64xf32>
    %452 = math.exp %451 : vector<8x64xf32>
    %cst_67 = arith.constant 1.000000e+00 : f32
    %453 = vector.broadcast %cst_67 : f32 to vector<8x64xf32>
    %454 = arith.addf %453, %452 : vector<8x64xf32>
    %455 = arith.divf %453, %454 : vector<8x64xf32>
    %456 = math.tanh %450 : vector<8x64xf32>
    %457 = vector.extract_strided_slice %455 {offsets = [0, 0], sizes = [8, 16], strides = [1, 1]} : vector<8x64xf32> to vector<8x16xf32>
    %458 = vector.extract_strided_slice %455 {offsets = [0, 16], sizes = [8, 16], strides = [1, 1]} : vector<8x64xf32> to vector<8x16xf32>
    %459 = vector.extract_strided_slice %455 {offsets = [0, 32], sizes = [8, 16], strides = [1, 1]} : vector<8x64xf32> to vector<8x16xf32>
    %460 = vector.extract_strided_slice %456 {offsets = [0, 48], sizes = [8, 16], strides = [1, 1]} : vector<8x64xf32> to vector<8x16xf32>
    %461 = arith.mulf %458, %420 : vector<8x16xf32>
    %462 = arith.mulf %457, %460 : vector<8x16xf32>
    %463 = arith.addf %461, %462 : vector<8x16xf32>
    %464 = math.tanh %463 : vector<8x16xf32>
    %465 = arith.mulf %459, %464 : vector<8x16xf32>
    %cst_68 = arith.constant dense<0.000000e+00> : vector<8x64xf32>
    %466 = tpu.matmul %465, %3, %cst_68 {dimension_numbers = #tpu.dot_dimension_numbers<[1], [0], [0], [1], [0, 0, 1, 1], [], []>} : vector<8x16xf32>, vector<16x64xf32>, vector<8x64xf32> -> vector<8x64xf32>
    %467 = vector.extract_strided_slice %448 {offsets = [0, 64], sizes = [8, 64], strides = [1, 1]} : vector<8x128xf32> to vector<8x64xf32>
    %468 = arith.addf %466, %467 : vector<8x64xf32>
    %469 = arith.addf %468, %13 : vector<8x64xf32>
    %470 = arith.negf %469 : vector<8x64xf32>
    %471 = math.exp %470 : vector<8x64xf32>
    %cst_69 = arith.constant 1.000000e+00 : f32
    %472 = vector.broadcast %cst_69 : f32 to vector<8x64xf32>
    %473 = arith.addf %472, %471 : vector<8x64xf32>
    %474 = arith.divf %472, %473 : vector<8x64xf32>
    %475 = math.tanh %469 : vector<8x64xf32>
    %476 = vector.extract_strided_slice %474 {offsets = [0, 0], sizes = [8, 16], strides = [1, 1]} : vector<8x64xf32> to vector<8x16xf32>
    %477 = vector.extract_strided_slice %474 {offsets = [0, 16], sizes = [8, 16], strides = [1, 1]} : vector<8x64xf32> to vector<8x16xf32>
    %478 = vector.extract_strided_slice %474 {offsets = [0, 32], sizes = [8, 16], strides = [1, 1]} : vector<8x64xf32> to vector<8x16xf32>
    %479 = vector.extract_strided_slice %475 {offsets = [0, 48], sizes = [8, 16], strides = [1, 1]} : vector<8x64xf32> to vector<8x16xf32>
    %480 = arith.mulf %477, %439 : vector<8x16xf32>
    %481 = arith.mulf %476, %479 : vector<8x16xf32>
    %482 = arith.addf %480, %481 : vector<8x16xf32>
    %483 = math.tanh %482 : vector<8x16xf32>
    %484 = arith.mulf %478, %483 : vector<8x16xf32>
    %485 = vector.broadcast %4 : vector<1x16xf32> to vector<8x16xf32>
    %486 = arith.mulf %484, %485 : vector<8x16xf32>
    %cst_70 = arith.constant dense<0.000000e+00> : vector<8xf32>
    %487 = vector.multi_reduction <add>, %486, %cst_70 [1] : vector<8x16xf32> to vector<8xf32>
    %488 = vector.shape_cast %487 : vector<8xf32> to vector<8x1xf32>
    %489 = arith.addf %488, %16 : vector<8x1xf32>
    %490 = tpu.concatenate %465, %484 in 1 : vector<8x16xf32>, vector<8x16xf32> -> vector<8x32xf32>
    %cst_71 = arith.constant dense<0.000000e+00> : vector<8x128xf32>
    %491 = tpu.matmul %490, %2, %cst_71 {dimension_numbers = #tpu.dot_dimension_numbers<[1], [0], [0], [1], [0, 0, 1, 1], [], []>} : vector<8x32xf32>, vector<32x128xf32>, vector<8x128xf32> -> vector<8x128xf32>
    %492 = vector.extract_strided_slice %491 {offsets = [0, 0], sizes = [8, 64], strides = [1, 1]} : vector<8x128xf32> to vector<8x64xf32>
    %493 = arith.addf %492, %10 : vector<8x64xf32>
    %494 = arith.negf %493 : vector<8x64xf32>
    %495 = math.exp %494 : vector<8x64xf32>
    %cst_72 = arith.constant 1.000000e+00 : f32
    %496 = vector.broadcast %cst_72 : f32 to vector<8x64xf32>
    %497 = arith.addf %496, %495 : vector<8x64xf32>
    %498 = arith.divf %496, %497 : vector<8x64xf32>
    %499 = math.tanh %493 : vector<8x64xf32>
    %500 = vector.extract_strided_slice %498 {offsets = [0, 0], sizes = [8, 16], strides = [1, 1]} : vector<8x64xf32> to vector<8x16xf32>
    %501 = vector.extract_strided_slice %498 {offsets = [0, 16], sizes = [8, 16], strides = [1, 1]} : vector<8x64xf32> to vector<8x16xf32>
    %502 = vector.extract_strided_slice %498 {offsets = [0, 32], sizes = [8, 16], strides = [1, 1]} : vector<8x64xf32> to vector<8x16xf32>
    %503 = vector.extract_strided_slice %499 {offsets = [0, 48], sizes = [8, 16], strides = [1, 1]} : vector<8x64xf32> to vector<8x16xf32>
    %504 = arith.mulf %501, %463 : vector<8x16xf32>
    %505 = arith.mulf %500, %503 : vector<8x16xf32>
    %506 = arith.addf %504, %505 : vector<8x16xf32>
    %507 = math.tanh %506 : vector<8x16xf32>
    %508 = arith.mulf %502, %507 : vector<8x16xf32>
    %cst_73 = arith.constant dense<0.000000e+00> : vector<8x64xf32>
    %509 = tpu.matmul %508, %3, %cst_73 {dimension_numbers = #tpu.dot_dimension_numbers<[1], [0], [0], [1], [0, 0, 1, 1], [], []>} : vector<8x16xf32>, vector<16x64xf32>, vector<8x64xf32> -> vector<8x64xf32>
    %510 = vector.extract_strided_slice %491 {offsets = [0, 64], sizes = [8, 64], strides = [1, 1]} : vector<8x128xf32> to vector<8x64xf32>
    %511 = arith.addf %509, %510 : vector<8x64xf32>
    %512 = arith.addf %511, %13 : vector<8x64xf32>
    %513 = arith.negf %512 : vector<8x64xf32>
    %514 = math.exp %513 : vector<8x64xf32>
    %cst_74 = arith.constant 1.000000e+00 : f32
    %515 = vector.broadcast %cst_74 : f32 to vector<8x64xf32>
    %516 = arith.addf %515, %514 : vector<8x64xf32>
    %517 = arith.divf %515, %516 : vector<8x64xf32>
    %518 = math.tanh %512 : vector<8x64xf32>
    %519 = vector.extract_strided_slice %517 {offsets = [0, 0], sizes = [8, 16], strides = [1, 1]} : vector<8x64xf32> to vector<8x16xf32>
    %520 = vector.extract_strided_slice %517 {offsets = [0, 16], sizes = [8, 16], strides = [1, 1]} : vector<8x64xf32> to vector<8x16xf32>
    %521 = vector.extract_strided_slice %517 {offsets = [0, 32], sizes = [8, 16], strides = [1, 1]} : vector<8x64xf32> to vector<8x16xf32>
    %522 = vector.extract_strided_slice %518 {offsets = [0, 48], sizes = [8, 16], strides = [1, 1]} : vector<8x64xf32> to vector<8x16xf32>
    %523 = arith.mulf %520, %482 : vector<8x16xf32>
    %524 = arith.mulf %519, %522 : vector<8x16xf32>
    %525 = arith.addf %523, %524 : vector<8x16xf32>
    %526 = math.tanh %525 : vector<8x16xf32>
    %527 = arith.mulf %521, %526 : vector<8x16xf32>
    %528 = vector.broadcast %4 : vector<1x16xf32> to vector<8x16xf32>
    %529 = arith.mulf %527, %528 : vector<8x16xf32>
    %cst_75 = arith.constant dense<0.000000e+00> : vector<8xf32>
    %530 = vector.multi_reduction <add>, %529, %cst_75 [1] : vector<8x16xf32> to vector<8xf32>
    %531 = vector.shape_cast %530 : vector<8xf32> to vector<8x1xf32>
    %532 = arith.addf %531, %16 : vector<8x1xf32>
    %533 = tpu.concatenate %508, %527 in 1 : vector<8x16xf32>, vector<8x16xf32> -> vector<8x32xf32>
    %cst_76 = arith.constant dense<0.000000e+00> : vector<8x128xf32>
    %534 = tpu.matmul %533, %2, %cst_76 {dimension_numbers = #tpu.dot_dimension_numbers<[1], [0], [0], [1], [0, 0, 1, 1], [], []>} : vector<8x32xf32>, vector<32x128xf32>, vector<8x128xf32> -> vector<8x128xf32>
    %535 = vector.extract_strided_slice %534 {offsets = [0, 0], sizes = [8, 64], strides = [1, 1]} : vector<8x128xf32> to vector<8x64xf32>
    %536 = arith.addf %535, %10 : vector<8x64xf32>
    %537 = arith.negf %536 : vector<8x64xf32>
    %538 = math.exp %537 : vector<8x64xf32>
    %cst_77 = arith.constant 1.000000e+00 : f32
    %539 = vector.broadcast %cst_77 : f32 to vector<8x64xf32>
    %540 = arith.addf %539, %538 : vector<8x64xf32>
    %541 = arith.divf %539, %540 : vector<8x64xf32>
    %542 = math.tanh %536 : vector<8x64xf32>
    %543 = vector.extract_strided_slice %541 {offsets = [0, 0], sizes = [8, 16], strides = [1, 1]} : vector<8x64xf32> to vector<8x16xf32>
    %544 = vector.extract_strided_slice %541 {offsets = [0, 16], sizes = [8, 16], strides = [1, 1]} : vector<8x64xf32> to vector<8x16xf32>
    %545 = vector.extract_strided_slice %541 {offsets = [0, 32], sizes = [8, 16], strides = [1, 1]} : vector<8x64xf32> to vector<8x16xf32>
    %546 = vector.extract_strided_slice %542 {offsets = [0, 48], sizes = [8, 16], strides = [1, 1]} : vector<8x64xf32> to vector<8x16xf32>
    %547 = arith.mulf %544, %506 : vector<8x16xf32>
    %548 = arith.mulf %543, %546 : vector<8x16xf32>
    %549 = arith.addf %547, %548 : vector<8x16xf32>
    %550 = math.tanh %549 : vector<8x16xf32>
    %551 = arith.mulf %545, %550 : vector<8x16xf32>
    %cst_78 = arith.constant dense<0.000000e+00> : vector<8x64xf32>
    %552 = tpu.matmul %551, %3, %cst_78 {dimension_numbers = #tpu.dot_dimension_numbers<[1], [0], [0], [1], [0, 0, 1, 1], [], []>} : vector<8x16xf32>, vector<16x64xf32>, vector<8x64xf32> -> vector<8x64xf32>
    %553 = vector.extract_strided_slice %534 {offsets = [0, 64], sizes = [8, 64], strides = [1, 1]} : vector<8x128xf32> to vector<8x64xf32>
    %554 = arith.addf %552, %553 : vector<8x64xf32>
    %555 = arith.addf %554, %13 : vector<8x64xf32>
    %556 = arith.negf %555 : vector<8x64xf32>
    %557 = math.exp %556 : vector<8x64xf32>
    %cst_79 = arith.constant 1.000000e+00 : f32
    %558 = vector.broadcast %cst_79 : f32 to vector<8x64xf32>
    %559 = arith.addf %558, %557 : vector<8x64xf32>
    %560 = arith.divf %558, %559 : vector<8x64xf32>
    %561 = math.tanh %555 : vector<8x64xf32>
    %562 = vector.extract_strided_slice %560 {offsets = [0, 0], sizes = [8, 16], strides = [1, 1]} : vector<8x64xf32> to vector<8x16xf32>
    %563 = vector.extract_strided_slice %560 {offsets = [0, 16], sizes = [8, 16], strides = [1, 1]} : vector<8x64xf32> to vector<8x16xf32>
    %564 = vector.extract_strided_slice %560 {offsets = [0, 32], sizes = [8, 16], strides = [1, 1]} : vector<8x64xf32> to vector<8x16xf32>
    %565 = vector.extract_strided_slice %561 {offsets = [0, 48], sizes = [8, 16], strides = [1, 1]} : vector<8x64xf32> to vector<8x16xf32>
    %566 = arith.mulf %563, %525 : vector<8x16xf32>
    %567 = arith.mulf %562, %565 : vector<8x16xf32>
    %568 = arith.addf %566, %567 : vector<8x16xf32>
    %569 = math.tanh %568 : vector<8x16xf32>
    %570 = arith.mulf %564, %569 : vector<8x16xf32>
    %571 = vector.broadcast %4 : vector<1x16xf32> to vector<8x16xf32>
    %572 = arith.mulf %570, %571 : vector<8x16xf32>
    %cst_80 = arith.constant dense<0.000000e+00> : vector<8xf32>
    %573 = vector.multi_reduction <add>, %572, %cst_80 [1] : vector<8x16xf32> to vector<8xf32>
    %574 = vector.shape_cast %573 : vector<8xf32> to vector<8x1xf32>
    %575 = arith.addf %574, %16 : vector<8x1xf32>
    %576 = tpu.concatenate %95, %139, %183, %227, %271, %315, %359, %403, %446, %489, %532, %575 in 1 : vector<8x1xf32>, vector<8x1xf32>, vector<8x1xf32>, vector<8x1xf32>, vector<8x1xf32>, vector<8x1xf32>, vector<8x1xf32>, vector<8x1xf32>, vector<8x1xf32>, vector<8x1xf32>, vector<8x1xf32>, vector<8x1xf32> -> vector<8x12xf32>
    %c0_81 = arith.constant 0 : index
    %c0_82 = arith.constant 0 : index
    %577 = vector.load %arg11[%c0_81, %c0_82] : memref<8x12xf32, #tpu.memory_space<vmem>>, vector<8x12xf32>
    tpu.vector_store %arg11[%c0_81, %c0_82], %576 {strides = array<i32>} : memref<8x12xf32, #tpu.memory_space<vmem>>, vector<8x12xf32>,
    return
  }
  func.func @transform_0(%arg0: i32) -> (i32, i32) {
    %c0_i32 = arith.constant 0 : i32
    %c0_i32_0 = arith.constant 0 : i32
    return %arg0, %c0_i32 : i32, i32
  }
  func.func @transform_1(%arg0: i32) -> (i32, i32) {
    %c0_i32 = arith.constant 0 : i32
    %c0_i32_0 = arith.constant 0 : i32
    %c0_i32_1 = arith.constant 0 : i32
    return %c0_i32, %c0_i32_0 : i32, i32
  }
  func.func @transform_2(%arg0: i32) -> (i32, i32) {
    %c0_i32 = arith.constant 0 : i32
    %c0_i32_0 = arith.constant 0 : i32
    %c0_i32_1 = arith.constant 0 : i32
    return %c0_i32, %c0_i32_0 : i32, i32
  }
  func.func @transform_3(%arg0: i32) -> (i32, i32) {
    %c0_i32 = arith.constant 0 : i32
    %c0_i32_0 = arith.constant 0 : i32
    %c0_i32_1 = arith.constant 0 : i32
    return %c0_i32, %c0_i32_0 : i32, i32
  }
  func.func @transform_4(%arg0: i32) -> (i32, i32) {
    %c0_i32 = arith.constant 0 : i32
    %c0_i32_0 = arith.constant 0 : i32
    %c0_i32_1 = arith.constant 0 : i32
    return %c0_i32, %c0_i32_0 : i32, i32
  }
  func.func @transform_5(%arg0: i32) -> (i32, i32) {
    %c0_i32 = arith.constant 0 : i32
    %c0_i32_0 = arith.constant 0 : i32
    %c0_i32_1 = arith.constant 0 : i32
    return %c0_i32, %c0_i32_0 : i32, i32
  }
  func.func @transform_6(%arg0: i32) -> (i32, i32) {
    %c0_i32 = arith.constant 0 : i32
    %c0_i32_0 = arith.constant 0 : i32
    %c0_i32_1 = arith.constant 0 : i32
    return %c0_i32, %c0_i32_0 : i32, i32
  }
  func.func @transform_7(%arg0: i32) -> (i32, i32) {
    %c0_i32 = arith.constant 0 : i32
    %c0_i32_0 = arith.constant 0 : i32
    %c0_i32_1 = arith.constant 0 : i32
    return %c0_i32, %c0_i32_0 : i32, i32
  }
  func.func @transform_8(%arg0: i32) -> (i32, i32) {
    %c0_i32 = arith.constant 0 : i32
    %c0_i32_0 = arith.constant 0 : i32
    %c0_i32_1 = arith.constant 0 : i32
    return %c0_i32, %c0_i32_0 : i32, i32
  }
  func.func @transform_9(%arg0: i32) -> (i32, i32) {
    %c0_i32 = arith.constant 0 : i32
    %c0_i32_0 = arith.constant 0 : i32
    %c0_i32_1 = arith.constant 0 : i32
    return %c0_i32, %c0_i32_0 : i32, i32
  }
  func.func @transform_10(%arg0: i32) -> (i32, i32) {
    %c0_i32 = arith.constant 0 : i32
    %c0_i32_0 = arith.constant 0 : i32
    return %arg0, %c0_i32 : i32, i32
  }
}

</mosaic_0001>

<bundles_post_ra>
// kernel: tpu_custom_call.1
= control target key start
LH: loop header
LB: loop body
LE: loop exit
PB: predicated region body
PF: predicated region fallthrough
CT: control target
= control target key end

     0   :  { %s4935_s0 = inlined_call_operand.vmem [shape: f32[16,8], index: 0, kind: input, shape index: {}]   ;;  %s4936_s1 = inlined_call_operand.vmem [shape: f32[1,64], index: 1, kind: input, shape index: {}]   ;;  %s4937_s2 = inlined_call_operand.vmem [shape: f32[32,128], index: 2, kind: input, shape index: {}]   ;;  %s4938_s3 = inlined_call_operand.hbm [shape: f32[32,128], index: 3, kind: input, shape index: {}]   ;;  %s4939_s4 = inlined_call_operand.hbm [shape: f32[16,64], index: 4, kind: input, shape index: {}]   ;;  %s4940_s5 = inlined_call_operand.vmem [shape: f32[1,64], index: 5, kind: input, shape index: {}]   ;;  %s4941_s6 = inlined_call_operand.vmem [shape: f32[1,64], index: 6, kind: input, shape index: {}]   ;;  %s4942_s7 = inlined_call_operand.vmem [shape: f32[1,64], index: 7, kind: input, shape index: {}]   ;;  %s4943_s8 = inlined_call_operand.vmem [shape: f32[1,16], index: 8, kind: input, shape index: {}]   ;;  %s4944_s9 = inlined_call_operand.<no memory space> [shape: f32[1,1], index: 9, kind: input, shape index: {}]   ;;  %s4945_s10 = inlined_call_operand.hbm [shape: f32[16,12], index: 10, kind: output, shape index: {}]  }
   0x1   :  { %v15_v0 = vstv %s4944_s9 }
   0x2   :  { %16 = vst [vmem:[#allocation2] sm:$0x1] %v15_v0 }
   0x3   :  { %17 = vsyncpa [#allocation4], 0 }
   0x4   :  { %18 = vsyncpa [#allocation7], 0 }
   0x5   :  { %19 = vsyncpa [#allocation5], 0 }
   0x6   :  { %21 = vsyncpa [#allocation5 + $0x1], 0  ;;  %s4252_s15 = smov 0   ;;  %s4254_s16 = smov 0  }
   0x7   :  { %s4256_s17 = smov 0   ;;  %s4258_s18 = smov 0  }
   0x8 LB: > { %4952 = sst [smem:[#allocation12_spill]] %s4155_s17  ;;  %s4273_s9 = sadd.s32 4294967295, %s4159_s18   ;;  %s4159_s18 = sphi %s4258_s18, %s4966_s18   ;;  %s4155_s17 = sphi %s4256_s17, %s4968_s17   ;;  %s4151_s16 = sphi %s4254_s16, %s4970_s16   ;;  %s4147_s15 = sphi %s4252_s15, %s4969_s15  }
   0x9   : > { %s3254_s19 = sadd.s32 4294967294, %s4159_s18   ;;  %s4277_s20 = sadd.s32 1, %s4159_s18  }
   0xa   : > { %4953 = sst [smem:[#allocation13_spill]] %s4277_s20  ;;  %s249_s21 = sadd.s32 1, %s4155_s17 }
   0xb   : > { %s246_s22 = ssub.s32 %s4159_s18, %s4277_s20  ;;  %p259_p0 = scmp.ne.s32.totalorder %s4155_s17, %s4151_s16 }
   0xc   : > { %p247_p1 = scmp.eq.s32.totalorder %s246_s22, 0  ;;  %p260_p2 = scmp.eq.s32.totalorder %s4273_s9, 1 }
   0xd   : > { %p265_p3 = scmp.ne.s32.totalorder %s4151_s16, %s4147_s15  ;;  %p266_p4 = scmp.eq.s32.totalorder %s3254_s19, 1 }
   0xe   : > { %s4288_s23 = scalar_select %p247_p1, %s4155_s17, %s249_s21  }
   0xf   : > { %p4290_p5 = por %p260_p2, %p259_p0  ;;  %p4294_p6 = por %p266_p4, %p265_p3 }
  0x10   : > { %4954 = sst [smem:[#allocation14_spill]] %s4288_s23  ;;  %p3255_p7 = scmp.ge.s32.totalorder %s4159_s18, 1 }
  0x11   : > { %s4955_s24 = scalar_select %p4290_p5, 1, 0 }
  0x12   : > { %s4956_s25 = scalar_select %p4294_p6, 1, 0 }
  0x13   : > { %p273_p8 = scmp.lt.s32.totalorder %s4159_s18, 3  ;;  %p4946_p9 = scmp.eq.s32.totalorder %s4273_s9, 0 }
  0x14   : > { %s4161_s27 = smov [#allocation3]   ;;  %s4162_s30 = smov [#allocation6]  }
  0x15   : > { %p4301_p10 = pnand %p3255_p7, %p273_p8  ;;  %s291_s28 = sshll.u32 %s4161_s27, 4  ;;  %s292_s28 = int_to_ptr.vmem [resolvable:$true] %s291_s28 }
  0x16   : > { %s304_s11 = sshll.u32 %s4162_s30, 4  ;;  %s4033_s14 = scalar_lea.hbm %s4938_s3, 512  ;;  %s4313_s11 = int_to_ptr.vmem [resolvable:$true] %s304_s11 }
  0x17   : > { %s4957_s26 = scalar_select %p4301_p10, 1, 0 }
  0x18   : > { %p3751_p11 = pneg %p4301_p10  ;;  %p4034_p13 = scmp.ne.s32.totalorder %s4938_s3, %s4033_s14 }
  0x19   : > { %p4040_p3 = scmp.lt.u32.totalorder %s4033_s14, %s4938_s3 }
  0x1a   : > { %p4309_p12 = pnand %p4946_p9, %p3751_p11 }
  0x1c   : > { %p4035_p0 = pneg %p4309_p12 }
  0x1e   : > { %p4036_p1 = pnand %p4035_p0, %p4034_p13 }
  0x20   : > { %p4037_p2 = pneg %p4036_p1 }
  0x22   : > { %p4042_p4 = pnand %p4040_p3, %p4037_p2 }
  0x24   : > { %4045 = shalt.err (!%p4042_p4)
}
  0x25   : > { %s4046_s30 = scalar_lea.vmem %s292_s28, 512  ;;  %p4054_p9 = scmp.lt.s32.totalorder %s292_s28, %s292_s28 }
  0x26   : > { %p4047_p7 = scmp.ne.s32.totalorder %s292_s28, %s4046_s30  ;;  %p4055_p6 = scmp.lt.s32.totalorder %s4046_s30, %s4046_s30 }
  0x28   : > { %p4049_p8 = pnand %p4047_p7, %p4035_p0  ;;  %p4056_p5 = por %p4055_p6, %p4054_p9 }
  0x2a   : > { %p4050_p11 = pneg %p4049_p8 }
  0x2c   : > { %p4057_p10 = pnand %p4056_p5, %p4050_p11 }
  0x2e   : > { %4060 = shalt.err (!%p4057_p10)
}
  0x2f   : > { %s4163_s12 = smov 128   ;;  %s4164_s13 = smov 8  }
  0x30   : > { %3754 = dma.hbm_to_vmem [thread:$0]  (!%p4309_p12), %s4938_s3, 512, %s292_s28, [#allocation4], %s4163_s12, %s4163_s12, %s4164_s13  }
  0x31   : > { %s4061_s27 = scalar_lea.hbm %s4939_s4, 256 }
  0x32   : > { %p4062_p13 = scmp.ne.s32.totalorder %s4939_s4, %s4061_s27  ;;  %p4068_p9 = scmp.lt.u32.totalorder %s4061_s27, %s4939_s4 }
  0x34   : > { %p4064_p5 = pnand %p4062_p13, %p4035_p0 }
  0x36   : > { %p4065_p6 = pneg %p4064_p5 }
  0x38   : > { %p4070_p10 = pnand %p4068_p9, %p4065_p6 }
  0x3a   : > { %4073 = shalt.err (!%p4070_p10)
}
  0x3b   : > { %s4074_s28 = scalar_lea.vmem %s4313_s11, 256  ;;  %p4082_p4 = scmp.lt.s32.totalorder %s4313_s11, %s4313_s11 }
  0x3c   : > { %p4075_p1 = scmp.ne.s32.totalorder %s4313_s11, %s4074_s28  ;;  %p4083_p7 = scmp.lt.s32.totalorder %s4074_s28, %s4074_s28 }
  0x3e   : > { %p4077_p2 = pnand %p4075_p1, %p4035_p0  ;;  %p4084_p8 = por %p4083_p7, %p4082_p4 }
  0x40   : > { %p4078_p3 = pneg %p4077_p2 }
  0x42   : > { %p4085_p11 = pnand %p4084_p8, %p4078_p3 }
  0x44   : > { %4088 = shalt.err (!%p4085_p11)
}
  0x45   : > { %3757 = dma.hbm_to_vmem [thread:$0]  (!%p4309_p12), %s4939_s4, 256, %s4313_s11, [#allocation7], %s4163_s12, %s4163_s12, %s4164_s13  }
  0x46   : > { %p4959_p13 = scmp.ne.s32.totalorder %s4957_s26, 0 }
  0x47   : > { %p4960_p5 = scmp.eq.s32.totalorder (!%p4959_p13), %s4273_s9, 0 }
  0x48   : > { %342 = sbr.rel (%p4959_p13) target bundleno = 17500 (0x445c), region = 60 }
  0x4f   : > { %4134 = dma.done.wait (%p4960_p5), [#allocation4], 512   ;;  %p4961_p0 = pmov %p4960_p5 }
  0x51   : > { %4136 = vsyncadd (%p4961_p0), [#allocation4], 4294966784  ;;  %p4962_p6 = pmov %p4961_p0 }
  0x52   : > { %p4963_p9 = pmov %p4961_p0 }
  0x53   : > { %4138 = dma.done.wait (%p4962_p6), [#allocation7], 256  }
  0x54   : > { %4140 = vsyncadd (%p4963_p9), [#allocation7], 4294967040  ;;  %v4165_v1 = vmov 0.0|0.0   ;;  %vm4166_vm0 = vmmov 0   ;;  %v4167_v2 = vmov 0.0   ;;  %p383_p12 = scmp.lt.s32.totalorder %s4273_s9, 1 }
  0x55   : > { %3633 = vmatprep.subr.bf16.mxu0 %v4165_v1  ;;  %3425 = vmatprep.mubr.msk.f32.mxu0 %vm4166_vm0, %v4167_v2  ;;  %v4168_v3 = vmov 0   ;;  %v388_v4 = vld [vmem:[%s4937_s2] sm:$0xff]  ;;  %v389_v5 = vld [vmem:[%s4937_s2 + $0x8] sm:$0xff]  ;;  %v390_v6 = vld [vmem:[%s4937_s2 + $0x10] sm:$0xff]  ;;  %s4169_s29 = smov 80   ;;  %s4170_s11 = smov 16  }
  0x56   : > { %3831 = vset.pattern.permute.xlu0 %v4168_v3  ;;  %3639 = vmatprep.subr.bf16.mxu1 %v4165_v1  ;;  %s384_s23 = scalar_select %p383_p12, %s4273_s9, 1  ;;  %v4392_v7 = vpack.c.bf16 %v389_v5, %v388_v4  ;;  %v391_v8 = vld [vmem:[%s4937_s2 + $0x18] sm:$0xff]  ;;  %v4412_v12 = vld [vmem:[%s4936_s1] ss:$0 sm:$0xff]  ;;  %v396_v29 = vld [vmem:[#allocation6] sm:$0xff]  ;;  %vm582_vm1 = vcmask 130048  }
  0x57   : > { %3432 = vmatprep.mubr.msk.f32.mxu1 %vm4166_vm0, %v4167_v2  ;;  %v4401_v10 = vpack.c.bf16 %v391_v8, %v390_v6  ;;  %v4417_v13 = vld [vmem:[%s4940_s5] ss:$0 sm:$0xff]  ;;  %v397_v30 = vld [vmem:[#allocation6 + $0x8] sm:$0xff]  ;;  %s4172_s13 = smov 96   ;;  %v4173_v53 = vmov 1   ;;  %s4174_s21 = smov 112  }
  0x58   : > { %s3263_s26 = sshll.u32 %s384_s23, 3  ;;  %3635 = vmatpush3.bf16.msra.mxu0 %v4392_v7  ;;  %v4426_v31 = vpack.c.bf16 %v397_v30, %v396_v29  ;;  %v4445_v37 = vld [vmem:[%s4942_s7] ss:$0 sm:$0xff]  ;;  %vm475_vm2 = vcmask 261120   ;;  %s4181_s23 = smov 32   ;;  %vm3135_vm3 = vcmask 7168  }
  0x59   : > { %s386_s12 = scalar_lea.vmem %s4935_s0, %s3263_s26  ;;  %3636 = vmatprep.subr.bf16.mxu0 %v4165_v1  ;;  %s4182_s26 = smov 2   ;;  %vm3137_vm4 = vcmask 15360   ;;  %vm3139_vm5 = vcmask 23552   ;;  %vm3141_vm6 = vcmask 31744   ;;  %vm3143_vm7 = vcmask 39936  }
  0x5a   : > { %v4397_v9 = vld [vmem:[%s386_s12] sm:$0xff]  ;;  %3641 = vmatpush3.bf16.msra.mxu1 %v4426_v31  ;;  %s4171_s12 = smov 64   ;;  %s4187_s14 = smov 4   ;;  %vm3145_vm8 = vcmask 48128   ;;  %vm3147_vm9 = vcmask 56320   ;;  %vm3149_vm10 = vcmask 64512  }
  0x5b   : > { %430 = vperm.xlu0 %3831, %v4397_v9   ;;  %3642 = vmatprep.subr.bf16.mxu1 %v4165_v1  ;;  %s4188_s19 = smov 5   ;;  %s4190_s22 = smov 9   ;;  %vm3151_vm11 = vcmask 72704   ;;  %vm3153_vm12 = vcmask 80896   ;;  %vm3155_vm13 = vcmask 89088   ;;  %vm3157_vm14 = vcmask 97280  }
  0x5c   : > { %3638 = vmatpush3.bf16.msra.mxu0 %v4401_v10  ;;  %s4191_s27 = smov 11   ;;  %s4192_s30 = smov 10  }
  0x5d   : > { %3648 = vmatprep.subr.bf16.mxu0 %v4165_v1  ;;  %s380_s28 = sand.u32 1, %s4151_s16   ;;  %s3318_s20 = sshll.u32 %s4273_s9, 7 }
  0x5e   : > { %s3262_s17 = sshll.u32 %s380_s28, 3  ;;  %s3160_s9 = scalar_lea.sflag [#allocation5], %s380_s28 }
  0x5f   : > { %3426 = vmatmul.mubr.f32.vlgmr.msra.gmra.mrb[0].mxu0 %v4167_v2  ;;  %3832 = vset.pattern.permute.xlu0 %v4173_v53  ;;  %p4964_p1 = scmp.ne.s32.totalorder %s4955_s24, 0 }
  0x60   : > { %3450 = vmatprep.mubr.msk.f32.mxu0 %vm4166_vm0, %v4167_v2  ;;  %3650 = vmatpush3.bf16.msra.mxu0 %v4426_v31 }
  0x61   : > { %3651 = vmatprep.subr.bf16.mxu0 %v4165_v1 }
  0xda   : > { %v431_v11 = vpop.permute.xlu0 %430 }
  0xdb   : > { %v439_v14 = vmul.f32 %v4412_v12, %v431_v11 }
 0x132   : > { %v545_v15 = vpop.f32.mrb[0].mxu0 }
 0x133   : > { %v549_v16 = vadd.f32 %v4417_v13, %v545_v15  ;;  %v3427_v17 = vpop.f32.mrb[1].mxu0 }
 0x135   : > { %v550_v18 = vadd.f32 %v549_v16, %v439_v14 }
 0x137   : > { %3840 = vtanh.f32 %v550_v18  ;;  %v3269_v20 = vmul.f32 -1.442695, %v550_v18 }
 0x139   : > { %3842 = vpow2.f32 %v3269_v20 }
 0x141   : > { %v3841_v19 = vpop.eup %3840 }
 0x142   : > { %560 = vrot.lane.b32.xlu0 %v3841_v19, %s4169_s29 }
 0x143   : > { %v3843_v21 = vpop.eup %3842 }
 0x144   : > { %v554_v22 = vadd.f32 1.0, %v3843_v21 }
 0x146   : > { %3844 = vrcp.f32 %v554_v22 }
 0x150   : > { %v3845_v23 = vpop.eup %3844 }
 0x151   : > { %v558_v26 = vmul.f32 0.0, %v3845_v23 }
 0x1b4   : > { %v561_v24 = vpop.permute.xlu0 %560 }
 0x1b5   : > { %v563_v25 = vmul.f32 %v3845_v23, %v561_v24 }
 0x1b7   : > { %565 = vrot.lane.b32.xlu1 %v563_v25, %s4170_s11 }
 0x229   : > { %v566_v27 = vpop.permute.xlu1 %565 }
 0x22a   : > { %v4423_v28 = vadd.f32 %v566_v27, %v558_v26 }
 0x22c   : > { %3846 = vtanh.f32 %v4423_v28 }
 0x236   : > { %v3847_v32 = vpop.eup %3846 }
 0x237   : > { %571 = vrot.lane.b32.xlu1 %v3847_v32, %s4170_s11 }
 0x23b   : > { %579 = vrot.lane.b32.xlu1 %v545_v15, %s4171_s12 }
 0x2a9   : > { %v572_v33 = vpop.permute.xlu1 %571 }
 0x2aa   : > { %v574_v34 = vmul.f32 %v3845_v23, %v572_v33 }
 0x2ac   : > { %576 = vrot.lane.b32.xlu0 %v574_v34, %s4172_s13 }
 0x2ad   : > { %v580_v36 = vpop.permute.xlu1 %579 }
 0x31e   : > { %v577_v35 = vpop.permute.xlu0 %576 }
 0x31f   : > { %3433 = vmatmul.mubr.msk.f32.vlgmr.msra.gmra.mrb[0].mxu1 %vm582_vm1, %v577_v35 }
 0x320   : > { %3644 = vmatpush3.bf16.msra.mxu1 %v4392_v7  ;;  %3443 = vmatprep.mubr.msk.f32.mxu1 %vm4166_vm0, %v4167_v2 }
 0x321   : > { %3645 = vmatprep.subr.bf16.mxu1 %v4165_v1 }
 0x324   : > { %3647 = vmatpush3.bf16.msra.mxu1 %v4401_v10 }
 0x325   : > { %3657 = vmatprep.subr.bf16.mxu1 %v4165_v1 }
 0x3f2   : > { %v651_v38 = vpop.f32.mrb[0].mxu1 }
 0x3f3   : > { %v652_v39 = vadd.f32 %v651_v38, %v580_v36  ;;  %v3434_v40 = vpop.f32.mrb[1].mxu1 }
 0x3f5   : > { %v655_v41 = vadd.f32 %v4445_v37, %v652_v39  ;;  %v4175_v39 = vmov 2  }
 0x3f6   : > { %3833 = vset.pattern.permute.xlu1 %v4175_v39 }
 0x3f7   : > { %3848 = vtanh.f32 %v655_v41  ;;  %v3271_v43 = vmul.f32 -1.442695, %v655_v41 }
 0x3f9   : > { %3850 = vpow2.f32 %v3271_v43 }
 0x401   : > { %v3849_v42 = vpop.eup %3848 }
 0x402   : > { %665 = vrot.lane.b32.xlu0 %v3849_v42, %s4169_s29 }
 0x403   : > { %v3851_v44 = vpop.eup %3850 }
 0x404   : > { %v659_v45 = vadd.f32 1.0, %v3851_v44 }
 0x406   : > { %3852 = vrcp.f32 %v659_v45 }
 0x410   : > { %v3853_v46 = vpop.eup %3852 }
 0x411   : > { %v663_v49 = vmul.f32 0.0, %v3853_v46 }
 0x474   : > { %v666_v47 = vpop.permute.xlu0 %665 }
 0x475   : > { %v668_v48 = vmul.f32 %v3853_v46, %v666_v47 }
 0x477   : > { %670 = vrot.lane.b32.xlu1 %v668_v48, %s4170_s11 }
 0x4e9   : > { %v671_v50 = vpop.permute.xlu1 %670 }
 0x4ea   : > { %v4450_v51 = vadd.f32 %v671_v50, %v663_v49 }
 0x4ec   : > { %3854 = vtanh.f32 %v4450_v51 }
 0x4f6   : > { %v3855_v52 = vpop.eup %3854 }
 0x4f7   : > { %676 = vrot.lane.b32.xlu0 %v3855_v52, %s4170_s11 }
 0x4fb   : > { %441 = vperm.xlu0 %3832, %v4397_v9  }
 0x569   : > { %v677_v54 = vpop.permute.xlu0 %676 }
 0x56a   : > { %v4455_v55 = vmul.f32 %v3853_v46, %v677_v54 }
 0x56c   : > { %699 = vrot.lane.b32.xlu1 %v4455_v55, %s4174_s21 }
 0x57a   : > { %v442_v58 = vpop.permute.xlu0 %441 }
 0x57b   : > { %v444_v59 = vmul.f32 %v4412_v12, %v442_v58 }
 0x5de   : > { %v700_v56 = vpop.permute.xlu1 %699 }
 0x5df   : > { %v702_v57 = vsel %vm582_vm1, %v577_v35, %v700_v56 }
 0x5e0   : > { %3444 = vmatmul.mubr.msk.f32.vlgmr.msra.gmra.mrb[2].mxu1 %vm475_vm2, %v702_v57 }
 0x5e1   : > { %3659 = vmatpush3.bf16.msra.mxu1 %v4426_v31  ;;  %3468 = vmatprep.mubr.msk.f32.mxu1 %vm4166_vm0, %v4167_v2 }
 0x5e2   : > { %3660 = vmatprep.subr.bf16.mxu1 %v4165_v1 }
 0x6b3   : > { %v772_v60 = vpop.f32.mrb[2].mxu1 }
 0x6b4   : > { %v776_v61 = vadd.f32 %v4417_v13, %v772_v60  ;;  %v3445_v62 = vpop.f32.mrb[3].mxu1 }
 0x6b6   : > { %v777_v63 = vadd.f32 %v776_v61, %v444_v59 }
 0x6b8   : > { %3856 = vtanh.f32 %v777_v63  ;;  %v3274_v3 = vmul.f32 -1.442695, %v777_v63 }
 0x6ba   : > { %3858 = vpow2.f32 %v3274_v3 }
 0x6c2   : > { %v3857_v0 = vpop.eup %3856 }
 0x6c3   : > { %787 = vrot.lane.b32.xlu1 %v3857_v0, %s4169_s29 }
 0x6c4   : > { %v3859_v4 = vpop.eup %3858 }
 0x6c5   : > { %v781_v5 = vadd.f32 1.0, %v3859_v4 }
 0x6c7   : > { %3860 = vrcp.f32 %v781_v5 }
 0x6d1   : > { %v3861_v6 = vpop.eup %3860 }
 0x6d2   : > { %v785_v14 = vmul.f32 %v3861_v6, %v4423_v28 }
 0x735   : > { %v788_v8 = vpop.permute.xlu1 %787 }
 0x736   : > { %v790_v11 = vmul.f32 %v3861_v6, %v788_v8 }
 0x738   : > { %792 = vrot.lane.b32.xlu1 %v790_v11, %s4170_s11 }
 0x7aa   : > { %v793_v15 = vpop.permute.xlu1 %792 }
 0x7ab   : > { %v4470_v16 = vadd.f32 %v793_v15, %v785_v14 }
 0x7ad   : > { %3862 = vtanh.f32 %v4470_v16 }
 0x7b7   : > { %v3863_v17 = vpop.eup %3862 }
 0x7b8   : > { %798 = vrot.lane.b32.xlu0 %v3863_v17, %s4170_s11 }
 0x7bc   : > { %806 = vrot.lane.b32.xlu0 %v772_v60, %s4171_s12 }
 0x82a   : > { %v799_v18 = vpop.permute.xlu0 %798 }
 0x82b   : > { %v801_v19 = vmul.f32 %v3861_v6, %v799_v18 }
 0x82d   : > { %803 = vrot.lane.b32.xlu1 %v801_v19, %s4172_s13 }
 0x82e   : > { %v807_v21 = vpop.permute.xlu0 %806 }
 0x89f   : > { %v804_v20 = vpop.permute.xlu1 %803 }
 0x8a0   : > { %3451 = vmatmul.mubr.msk.f32.vlgmr.msra.gmra.mrb[2].mxu0 %vm582_vm1, %v804_v20 }
 0x8a1   : > { %3653 = vmatpush3.bf16.msra.mxu0 %v4392_v7  ;;  %3461 = vmatprep.mubr.msk.f32.mxu0 %vm4166_vm0, %v4167_v2 }
 0x8a2   : > { %3654 = vmatprep.subr.bf16.mxu0 %v4165_v1 }
 0x8a5   : > { %3656 = vmatpush3.bf16.msra.mxu0 %v4401_v10 }
 0x8a6   : > { %3666 = vmatprep.subr.bf16.mxu0 %v4165_v1 }
 0x973   : > { %v877_v22 = vpop.f32.mrb[2].mxu0 }
 0x974   : > { %v878_v23 = vadd.f32 %v877_v22, %v807_v21  ;;  %v3452_v24 = vpop.f32.mrb[3].mxu0 }
 0x975   : > { %v4176_v24 = vmov 3  }
 0x976   : > { %v881_v25 = vadd.f32 %v4445_v37, %v878_v23 }
 0x978   : > { %3864 = vtanh.f32 %v881_v25  ;;  %v3276_v27 = vmul.f32 -1.442695, %v881_v25 }
 0x97a   : > { %3866 = vpow2.f32 %v3276_v27 }
 0x982   : > { %v3865_v26 = vpop.eup %3864 }
 0x983   : > { %891 = vrot.lane.b32.xlu1 %v3865_v26, %s4169_s29 }
 0x984   : > { %v3867_v28 = vpop.eup %3866 }
 0x985   : > { %v885_v29 = vadd.f32 1.0, %v3867_v28 }
 0x987   : > { %3868 = vrcp.f32 %v885_v29 }
 0x991   : > { %v3869_v30 = vpop.eup %3868 }
 0x992   : > { %v889_v34 = vmul.f32 %v3869_v30, %v4450_v51 }
 0x9f5   : > { %v892_v32 = vpop.permute.xlu1 %891 }
 0x9f6   : > { %v894_v33 = vmul.f32 %v3869_v30, %v892_v32 }
 0x9f8   : > { %896 = vrot.lane.b32.xlu0 %v894_v33, %s4170_s11 }
 0xa6a   : > { %v897_v35 = vpop.permute.xlu0 %896 }
 0xa6b   : > { %v4487_v36 = vadd.f32 %v897_v35, %v889_v34 }
 0xa6d   : > { %3870 = vtanh.f32 %v4487_v36 }
 0xa77   : > { %v3871_v38 = vpop.eup %3870 }
 0xa78   : > { %902 = vrot.lane.b32.xlu1 %v3871_v38, %s4170_s11 }
 0xa7c   : > { %446 = vperm.xlu1 %3833, %v4397_v9  }
 0xa80   : > { %3834 = vset.pattern.permute.xlu1 %v4176_v24 }
 0xaea   : > { %v903_v40 = vpop.permute.xlu1 %902 }
 0xaeb   : > { %v4492_v41 = vmul.f32 %v3869_v30, %v903_v40 }
 0xaed   : > { %917 = vrot.lane.b32.xlu0 %v4492_v41, %s4174_s21 }
 0xafb   : > { %v447_v44 = vpop.permute.xlu1 %446 }
 0xafc   : > { %v449_v45 = vmul.f32 %v4412_v12, %v447_v44 }
 0xb5f   : > { %v918_v42 = vpop.permute.xlu0 %917 }
 0xb60   : > { %v920_v43 = vsel %vm582_vm1, %v804_v20, %v918_v42 }
 0xb61   : > { %3462 = vmatmul.mubr.msk.f32.vlgmr.msra.gmra.mrb[4].mxu0 %vm475_vm2, %v920_v43 }
 0xb62   : > { %3668 = vmatpush3.bf16.msra.mxu0 %v4426_v31  ;;  %3486 = vmatprep.mubr.msk.f32.mxu0 %vm4166_vm0, %v4167_v2 }
 0xb63   : > { %3669 = vmatprep.subr.bf16.mxu0 %v4165_v1 }
 0xc34   : > { %v990_v46 = vpop.f32.mrb[4].mxu0 }
 0xc35   : > { %v994_v47 = vadd.f32 %v4417_v13, %v990_v46  ;;  %v3463_v48 = vpop.f32.mrb[5].mxu0 }
 0xc37   : > { %v995_v49 = vadd.f32 %v994_v47, %v449_v45 }
 0xc39   : > { %3872 = vtanh.f32 %v995_v49  ;;  %v3278_v51 = vmul.f32 -1.442695, %v995_v49 }
 0xc3b   : > { %3874 = vpow2.f32 %v3278_v51 }
 0xc43   : > { %v3873_v50 = vpop.eup %3872 }
 0xc44   : > { %1005 = vrot.lane.b32.xlu0 %v3873_v50, %s4169_s29 }
 0xc45   : > { %v3875_v52 = vpop.eup %3874 }
 0xc46   : > { %v999_v53 = vadd.f32 1.0, %v3875_v52 }
 0xc48   : > { %3876 = vrcp.f32 %v999_v53 }
 0xc52   : > { %v3877_v54 = vpop.eup %3876 }
 0xc53   : > { %v1003_v58 = vmul.f32 %v3877_v54, %v4470_v16 }
 0xcb6   : > { %v1006_v56 = vpop.permute.xlu0 %1005 }
 0xcb7   : > { %v1008_v57 = vmul.f32 %v3877_v54, %v1006_v56 }
 0xcb9   : > { %1010 = vrot.lane.b32.xlu1 %v1008_v57, %s4170_s11 }
 0xd2b   : > { %v1011_v59 = vpop.permute.xlu1 %1010 }
 0xd2c   : > { %v4507_v60 = vadd.f32 %v1011_v59, %v1003_v58 }
 0xd2e   : > { %3878 = vtanh.f32 %v4507_v60 }
 0xd38   : > { %v3879_v61 = vpop.eup %3878 }
 0xd39   : > { %1016 = vrot.lane.b32.xlu0 %v3879_v61, %s4170_s11 }
 0xd3d   : > { %1024 = vrot.lane.b32.xlu0 %v990_v46, %s4171_s12 }
 0xdab   : > { %v1017_v62 = vpop.permute.xlu0 %1016 }
 0xdac   : > { %v1019_v63 = vmul.f32 %v3877_v54, %v1017_v62 }
 0xdae   : > { %1021 = vrot.lane.b32.xlu1 %v1019_v63, %s4172_s13 }
 0xdaf   : > { %v1025_v3 = vpop.permute.xlu0 %1024 }
 0xe20   : > { %v1022_v0 = vpop.permute.xlu1 %1021 }
 0xe21   : > { %3469 = vmatmul.mubr.msk.f32.vlgmr.msra.gmra.mrb[4].mxu1 %vm582_vm1, %v1022_v0 }
 0xe22   : > { %3662 = vmatpush3.bf16.msra.mxu1 %v4392_v7  ;;  %3479 = vmatprep.mubr.msk.f32.mxu1 %vm4166_vm0, %v4167_v2 }
 0xe23   : > { %3663 = vmatprep.subr.bf16.mxu1 %v4165_v1 }
 0xe26   : > { %3665 = vmatpush3.bf16.msra.mxu1 %v4401_v10 }
 0xe27   : > { %3675 = vmatprep.subr.bf16.mxu1 %v4165_v1 }
 0xef4   : > { %v1095_v4 = vpop.f32.mrb[4].mxu1 }
 0xef5   : > { %v1096_v5 = vadd.f32 %v1095_v4, %v1025_v3  ;;  %v3470_v6 = vpop.f32.mrb[5].mxu1 }
 0xef7   : > { %v1099_v8 = vadd.f32 %v4445_v37, %v1096_v5 }
 0xef9   : > { %3880 = vtanh.f32 %v1099_v8  ;;  %v3280_v14 = vmul.f32 -1.442695, %v1099_v8  ;;  %v4177_v8 = vmov 4  }
 0xefb   : > { %3882 = vpow2.f32 %v3280_v14 }
 0xf03   : > { %v3881_v11 = vpop.eup %3880 }
 0xf04   : > { %1109 = vrot.lane.b32.xlu1 %v3881_v11, %s4169_s29 }
 0xf05   : > { %v3883_v15 = vpop.eup %3882 }
 0xf06   : > { %v1103_v16 = vadd.f32 1.0, %v3883_v15 }
 0xf08   : > { %3884 = vrcp.f32 %v1103_v16 }
 0xf12   : > { %v3885_v17 = vpop.eup %3884 }
 0xf13   : > { %v1107_v20 = vmul.f32 %v3885_v17, %v4487_v36 }
 0xf76   : > { %v1110_v18 = vpop.permute.xlu1 %1109 }
 0xf77   : > { %v1112_v19 = vmul.f32 %v3885_v17, %v1110_v18 }
 0xf79   : > { %1114 = vrot.lane.b32.xlu0 %v1112_v19, %s4170_s11 }
 0xfeb   : > { %v1115_v21 = vpop.permute.xlu0 %1114 }
 0xfec   : > { %v4524_v22 = vadd.f32 %v1115_v21, %v1107_v20 }
 0xfee   : > { %3886 = vtanh.f32 %v4524_v22 }
 0xff8   : > { %v3887_v23 = vpop.eup %3886 }
 0xff9   : > { %1120 = vrot.lane.b32.xlu1 %v3887_v23, %s4170_s11 }
 0xffd   : > { %451 = vperm.xlu1 %3834, %v4397_v9  }
0x1001   : > { %3835 = vset.pattern.permute.xlu1 %v4177_v8 }
0x106b   : > { %v1121_v25 = vpop.permute.xlu1 %1120 }
0x106c   : > { %v4529_v26 = vmul.f32 %v3885_v17, %v1121_v25 }
0x106e   : > { %1135 = vrot.lane.b32.xlu0 %v4529_v26, %s4174_s21 }
0x107c   : > { %v452_v29 = vpop.permute.xlu1 %451 }
0x107d   : > { %v454_v30 = vmul.f32 %v4412_v12, %v452_v29 }
0x10e0   : > { %v1136_v27 = vpop.permute.xlu0 %1135 }
0x10e1   : > { %v1138_v28 = vsel %vm582_vm1, %v1022_v0, %v1136_v27 }
0x10e2   : > { %3480 = vmatmul.mubr.msk.f32.vlgmr.msra.gmra.mrb[6].mxu1 %vm475_vm2, %v1138_v28 }
0x10e3   : > { %3677 = vmatpush3.bf16.msra.mxu1 %v4426_v31  ;;  %3504 = vmatprep.mubr.msk.f32.mxu1 %vm4166_vm0, %v4167_v2 }
0x10e4   : > { %3678 = vmatprep.subr.bf16.mxu1 %v4165_v1 }
0x11b5   : > { %v1208_v32 = vpop.f32.mrb[6].mxu1 }
0x11b6   : > { %v1212_v33 = vadd.f32 %v4417_v13, %v1208_v32  ;;  %v3481_v34 = vpop.f32.mrb[7].mxu1 }
0x11b8   : > { %v1213_v35 = vadd.f32 %v1212_v33, %v454_v30 }
0x11ba   : > { %3888 = vtanh.f32 %v1213_v35  ;;  %v3282_v38 = vmul.f32 -1.442695, %v1213_v35 }
0x11bc   : > { %3890 = vpow2.f32 %v3282_v38 }
0x11c4   : > { %v3889_v36 = vpop.eup %3888 }
0x11c5   : > { %1223 = vrot.lane.b32.xlu0 %v3889_v36, %s4169_s29 }
0x11c6   : > { %v3891_v39 = vpop.eup %3890 }
0x11c7   : > { %v1217_v40 = vadd.f32 1.0, %v3891_v39 }
0x11c9   : > { %3892 = vrcp.f32 %v1217_v40 }
0x11d3   : > { %v3893_v42 = vpop.eup %3892 }
0x11d4   : > { %v1221_v45 = vmul.f32 %v3893_v42, %v4507_v60 }
0x1237   : > { %v1224_v43 = vpop.permute.xlu0 %1223 }
0x1238   : > { %v1226_v44 = vmul.f32 %v3893_v42, %v1224_v43 }
0x123a   : > { %1228 = vrot.lane.b32.xlu1 %v1226_v44, %s4170_s11 }
0x12ac   : > { %v1229_v46 = vpop.permute.xlu1 %1228 }
0x12ad   : > { %v4544_v47 = vadd.f32 %v1229_v46, %v1221_v45 }
0x12af   : > { %3894 = vtanh.f32 %v4544_v47 }
0x12b9   : > { %v3895_v48 = vpop.eup %3894 }
0x12ba   : > { %1234 = vrot.lane.b32.xlu0 %v3895_v48, %s4170_s11 }
0x12be   : > { %1242 = vrot.lane.b32.xlu0 %v1208_v32, %s4171_s12 }
0x132c   : > { %v1235_v49 = vpop.permute.xlu0 %1234 }
0x132d   : > { %v1237_v50 = vmul.f32 %v3893_v42, %v1235_v49 }
0x132f   : > { %1239 = vrot.lane.b32.xlu1 %v1237_v50, %s4172_s13 }
0x1330   : > { %v1243_v52 = vpop.permute.xlu0 %1242 }
0x13a1   : > { %v1240_v51 = vpop.permute.xlu1 %1239 }
0x13a2   : > { %3487 = vmatmul.mubr.msk.f32.vlgmr.msra.gmra.mrb[6].mxu0 %vm582_vm1, %v1240_v51 }
0x13a3   : > { %3671 = vmatpush3.bf16.msra.mxu0 %v4392_v7  ;;  %3497 = vmatprep.mubr.msk.f32.mxu0 %vm4166_vm0, %v4167_v2 }
0x13a4   : > { %3672 = vmatprep.subr.bf16.mxu0 %v4165_v1 }
0x13a7   : > { %3674 = vmatpush3.bf16.msra.mxu0 %v4401_v10 }
0x13a8   : > { %3684 = vmatprep.subr.bf16.mxu0 %v4165_v1 }
0x1475   : > { %v1313_v53 = vpop.f32.mrb[6].mxu0 }
0x1476   : > { %v1314_v54 = vadd.f32 %v1313_v53, %v1243_v52  ;;  %v3488_v56 = vpop.f32.mrb[7].mxu0 }
0x1478   : > { %v1317_v57 = vadd.f32 %v4445_v37, %v1314_v54 }
0x147a   : > { %3896 = vtanh.f32 %v1317_v57  ;;  %v3284_v59 = vmul.f32 -1.442695, %v1317_v57 }
0x147c   : > { %3898 = vpow2.f32 %v3284_v59 }
0x1484   : > { %v3897_v58 = vpop.eup %3896 }
0x1485   : > { %1327 = vrot.lane.b32.xlu1 %v3897_v58, %s4169_s29  ;;  %v4178_v58 = vmov 5  }
0x1486   : > { %v3899_v60 = vpop.eup %3898 }
0x1487   : > { %v1321_v61 = vadd.f32 1.0, %v3899_v60 }
0x1489   : > { %3900 = vrcp.f32 %v1321_v61 }
0x1493   : > { %v3901_v62 = vpop.eup %3900 }
0x1494   : > { %v1325_v3 = vmul.f32 %v3901_v62, %v4524_v22 }
0x14f7   : > { %v1328_v63 = vpop.permute.xlu1 %1327 }
0x14f8   : > { %v1330_v0 = vmul.f32 %v3901_v62, %v1328_v63 }
0x14fa   : > { %1332 = vrot.lane.b32.xlu0 %v1330_v0, %s4170_s11 }
0x156c   : > { %v1333_v4 = vpop.permute.xlu0 %1332 }
0x156d   : > { %v4561_v5 = vadd.f32 %v1333_v4, %v1325_v3 }
0x156f   : > { %3902 = vtanh.f32 %v4561_v5 }
0x1579   : > { %v3903_v6 = vpop.eup %3902 }
0x157a   : > { %1338 = vrot.lane.b32.xlu1 %v3903_v6, %s4170_s11 }
0x157e   : > { %456 = vperm.xlu1 %3835, %v4397_v9  }
0x1582   : > { %3836 = vset.pattern.permute.xlu1 %v4178_v58 }
0x15ec   : > { %v1339_v11 = vpop.permute.xlu1 %1338 }
0x15ed   : > { %v4566_v14 = vmul.f32 %v3901_v62, %v1339_v11 }
0x15ef   : > { %1353 = vrot.lane.b32.xlu0 %v4566_v14, %s4174_s21 }
0x15fd   : > { %v457_v17 = vpop.permute.xlu1 %456 }
0x15fe   : > { %v459_v18 = vmul.f32 %v4412_v12, %v457_v17 }
0x1661   : > { %v1354_v15 = vpop.permute.xlu0 %1353 }
0x1662   : > { %v1356_v16 = vsel %vm582_vm1, %v1240_v51, %v1354_v15 }
0x1663   : > { %3498 = vmatmul.mubr.msk.f32.vlgmr.msra.gmra.mrb[8].mxu0 %vm475_vm2, %v1356_v16 }
0x1664   : > { %3686 = vmatpush3.bf16.msra.mxu0 %v4426_v31  ;;  %3522 = vmatprep.mubr.msk.f32.mxu0 %vm4166_vm0, %v4167_v2 }
0x1665   : > { %3687 = vmatprep.subr.bf16.mxu0 %v4165_v1 }
0x1736   : > { %v1426_v19 = vpop.f32.mrb[8].mxu0 }
0x1737   : > { %v1430_v20 = vadd.f32 %v4417_v13, %v1426_v19  ;;  %v3499_v21 = vpop.f32.mrb[9].mxu0 }
0x1739   : > { %v1431_v22 = vadd.f32 %v1430_v20, %v459_v18 }
0x173b   : > { %3904 = vtanh.f32 %v1431_v22  ;;  %v3286_v24 = vmul.f32 -1.442695, %v1431_v22 }
0x173d   : > { %3906 = vpow2.f32 %v3286_v24 }
0x1745   : > { %v3905_v23 = vpop.eup %3904 }
0x1746   : > { %1441 = vrot.lane.b32.xlu0 %v3905_v23, %s4169_s29 }
0x1747   : > { %v3907_v25 = vpop.eup %3906 }
0x1748   : > { %v1435_v27 = vadd.f32 1.0, %v3907_v25 }
0x174a   : > { %3908 = vrcp.f32 %v1435_v27 }
0x1754   : > { %v3909_v28 = vpop.eup %3908 }
0x1755   : > { %v1439_v32 = vmul.f32 %v3909_v28, %v4544_v47 }
0x17b8   : > { %v1442_v29 = vpop.permute.xlu0 %1441 }
0x17b9   : > { %v1444_v30 = vmul.f32 %v3909_v28, %v1442_v29 }
0x17bb   : > { %1446 = vrot.lane.b32.xlu1 %v1444_v30, %s4170_s11 }
0x182d   : > { %v1447_v33 = vpop.permute.xlu1 %1446 }
0x182e   : > { %v4581_v34 = vadd.f32 %v1447_v33, %v1439_v32 }
0x1830   : > { %3910 = vtanh.f32 %v4581_v34 }
0x183a   : > { %v3911_v35 = vpop.eup %3910 }
0x183b   : > { %1452 = vrot.lane.b32.xlu0 %v3911_v35, %s4170_s11 }
0x183f   : > { %1460 = vrot.lane.b32.xlu0 %v1426_v19, %s4171_s12 }
0x18ad   : > { %v1453_v36 = vpop.permute.xlu0 %1452 }
0x18ae   : > { %v1455_v38 = vmul.f32 %v3909_v28, %v1453_v36 }
0x18b0   : > { %1457 = vrot.lane.b32.xlu1 %v1455_v38, %s4172_s13 }
0x18b1   : > { %v1461_v40 = vpop.permute.xlu0 %1460 }
0x1922   : > { %v1458_v39 = vpop.permute.xlu1 %1457 }
0x1923   : > { %3505 = vmatmul.mubr.msk.f32.vlgmr.msra.gmra.mrb[8].mxu1 %vm582_vm1, %v1458_v39 }
0x1924   : > { %3680 = vmatpush3.bf16.msra.mxu1 %v4392_v7  ;;  %3515 = vmatprep.mubr.msk.f32.mxu1 %vm4166_vm0, %v4167_v2 }
0x1925   : > { %3681 = vmatprep.subr.bf16.mxu1 %v4165_v1 }
0x1928   : > { %3683 = vmatpush3.bf16.msra.mxu1 %v4401_v10 }
0x1929   : > { %3693 = vmatprep.subr.bf16.mxu1 %v4165_v1 }
0x19f6   : > { %v1531_v42 = vpop.f32.mrb[8].mxu1 }
0x19f7   : > { %v1532_v43 = vadd.f32 %v1531_v42, %v1461_v40  ;;  %v3506_v44 = vpop.f32.mrb[9].mxu1 }
0x19f9   : > { %v1535_v45 = vadd.f32 %v4445_v37, %v1532_v43 }
0x19fb   : > { %3912 = vtanh.f32 %v1535_v45  ;;  %v3288_v47 = vmul.f32 -1.442695, %v1535_v45 }
0x19fd   : > { %3914 = vpow2.f32 %v3288_v47  ;;  %v4179_v47 = vmov 6  }
0x1a05   : > { %v3913_v46 = vpop.eup %3912 }
0x1a06   : > { %1545 = vrot.lane.b32.xlu1 %v3913_v46, %s4169_s29 }
0x1a07   : > { %v3915_v48 = vpop.eup %3914 }
0x1a08   : > { %v1539_v49 = vadd.f32 1.0, %v3915_v48 }
0x1a0a   : > { %3916 = vrcp.f32 %v1539_v49 }
0x1a14   : > { %v3917_v50 = vpop.eup %3916 }
0x1a15   : > { %v1543_v53 = vmul.f32 %v3917_v50, %v4561_v5 }
0x1a78   : > { %v1546_v51 = vpop.permute.xlu1 %1545 }
0x1a79   : > { %v1548_v52 = vmul.f32 %v3917_v50, %v1546_v51 }
0x1a7b   : > { %1550 = vrot.lane.b32.xlu0 %v1548_v52, %s4170_s11 }
0x1aed   : > { %v1551_v54 = vpop.permute.xlu0 %1550 }
0x1aee   : > { %v4598_v56 = vadd.f32 %v1551_v54, %v1543_v53 }
0x1af0   : > { %3918 = vtanh.f32 %v4598_v56 }
0x1afa   : > { %v3919_v57 = vpop.eup %3918 }
0x1afb   : > { %1556 = vrot.lane.b32.xlu1 %v3919_v57, %s4170_s11 }
0x1aff   : > { %461 = vperm.xlu1 %3836, %v4397_v9  }
0x1b03   : > { %3837 = vset.pattern.permute.xlu1 %v4179_v47 }
0x1b6d   : > { %v1557_v59 = vpop.permute.xlu1 %1556 }
0x1b6e   : > { %v4603_v60 = vmul.f32 %v3917_v50, %v1557_v59 }
0x1b70   : > { %1571 = vrot.lane.b32.xlu0 %v4603_v60, %s4174_s21 }
0x1b7e   : > { %v462_v63 = vpop.permute.xlu1 %461 }
0x1b7f   : > { %v464_v0 = vmul.f32 %v4412_v12, %v462_v63 }
0x1be2   : > { %v1572_v61 = vpop.permute.xlu0 %1571 }
0x1be3   : > { %v1574_v62 = vsel %vm582_vm1, %v1458_v39, %v1572_v61 }
0x1be4   : > { %3516 = vmatmul.mubr.msk.f32.vlgmr.msra.gmra.mrb[10].mxu1 %vm475_vm2, %v1574_v62 }
0x1be5   : > { %3695 = vmatpush3.bf16.msra.mxu1 %v4426_v31  ;;  %3540 = vmatprep.mubr.msk.f32.mxu1 %vm4166_vm0, %v4167_v2 }
0x1be6   : > { %3696 = vmatprep.subr.bf16.mxu1 %v4165_v1 }
0x1cb7   : > { %v1644_v3 = vpop.f32.mrb[10].mxu1 }
0x1cb8   : > { %v1648_v4 = vadd.f32 %v4417_v13, %v1644_v3  ;;  %v3517_v5 = vpop.f32.mrb[11].mxu1 }
0x1cba   : > { %v1649_v6 = vadd.f32 %v1648_v4, %v464_v0 }
0x1cbc   : > { %3920 = vtanh.f32 %v1649_v6  ;;  %v3290_v11 = vmul.f32 -1.442695, %v1649_v6 }
0x1cbe   : > { %3922 = vpow2.f32 %v3290_v11 }
0x1cc6   : > { %v3921_v8 = vpop.eup %3920 }
0x1cc7   : > { %1659 = vrot.lane.b32.xlu0 %v3921_v8, %s4169_s29 }
0x1cc8   : > { %v3923_v15 = vpop.eup %3922 }
0x1cc9   : > { %v1653_v16 = vadd.f32 1.0, %v3923_v15 }
0x1ccb   : > { %3924 = vrcp.f32 %v1653_v16 }
0x1cd5   : > { %v3925_v17 = vpop.eup %3924 }
0x1cd6   : > { %v1657_v20 = vmul.f32 %v3925_v17, %v4581_v34 }
0x1d39   : > { %v1660_v18 = vpop.permute.xlu0 %1659 }
0x1d3a   : > { %v1662_v19 = vmul.f32 %v3925_v17, %v1660_v18 }
0x1d3c   : > { %1664 = vrot.lane.b32.xlu1 %v1662_v19, %s4170_s11 }
0x1dae   : > { %v1665_v21 = vpop.permute.xlu1 %1664 }
0x1daf   : > { %v4618_v22 = vadd.f32 %v1665_v21, %v1657_v20 }
0x1db1   : > { %3926 = vtanh.f32 %v4618_v22 }
0x1dbb   : > { %v3927_v23 = vpop.eup %3926 }
0x1dbc   : > { %1670 = vrot.lane.b32.xlu0 %v3927_v23, %s4170_s11 }
0x1dc0   : > { %1678 = vrot.lane.b32.xlu0 %v1644_v3, %s4171_s12 }
0x1e2e   : > { %v1671_v24 = vpop.permute.xlu0 %1670 }
0x1e2f   : > { %v1673_v25 = vmul.f32 %v3925_v17, %v1671_v24 }
0x1e31   : > { %1675 = vrot.lane.b32.xlu1 %v1673_v25, %s4172_s13 }
0x1e32   : > { %v1679_v28 = vpop.permute.xlu0 %1678 }
0x1ea3   : > { %v1676_v27 = vpop.permute.xlu1 %1675 }
0x1ea4   : > { %3523 = vmatmul.mubr.msk.f32.vlgmr.msra.gmra.mrb[10].mxu0 %vm582_vm1, %v1676_v27 }
0x1ea5   : > { %3689 = vmatpush3.bf16.msra.mxu0 %v4392_v7  ;;  %3533 = vmatprep.mubr.msk.f32.mxu0 %vm4166_vm0, %v4167_v2 }
0x1ea6   : > { %3690 = vmatprep.subr.bf16.mxu0 %v4165_v1 }
0x1ea9   : > { %3692 = vmatpush3.bf16.msra.mxu0 %v4401_v10 }
0x1eaa   : > { %3702 = vmatprep.subr.bf16.mxu0 %v4165_v1 }
0x1f77   : > { %v1749_v29 = vpop.f32.mrb[10].mxu0 }
0x1f78   : > { %v1750_v30 = vadd.f32 %v1749_v29, %v1679_v28  ;;  %v3524_v32 = vpop.f32.mrb[11].mxu0 }
0x1f7a   : > { %v1753_v33 = vadd.f32 %v4445_v37, %v1750_v30 }
0x1f7c   : > { %3928 = vtanh.f32 %v1753_v33  ;;  %v3292_v35 = vmul.f32 -1.442695, %v1753_v33 }
0x1f7e   : > { %3930 = vpow2.f32 %v3292_v35 }
0x1f86   : > { %v3929_v34 = vpop.eup %3928 }
0x1f87   : > { %1763 = vrot.lane.b32.xlu1 %v3929_v34, %s4169_s29  ;;  %v4180_v34 = vmov 7  }
0x1f88   : > { %v3931_v36 = vpop.eup %3930  ;;  %3839 = vset.pattern.permute.xlu0 %v4180_v34 }
0x1f89   : > { %v1757_v38 = vadd.f32 1.0, %v3931_v36 }
0x1f8b   : > { %3932 = vrcp.f32 %v1757_v38 }
0x1f95   : > { %v3933_v39 = vpop.eup %3932 }
0x1f96   : > { %v1761_v43 = vmul.f32 %v3933_v39, %v4598_v56 }
0x1ff9   : > { %v1764_v40 = vpop.permute.xlu1 %1763 }
0x1ffa   : > { %v1766_v42 = vmul.f32 %v3933_v39, %v1764_v40 }
0x1ffc   : > { %1768 = vrot.lane.b32.xlu0 %v1766_v42, %s4170_s11 }
0x206e   : > { %v1769_v44 = vpop.permute.xlu0 %1768 }
0x206f   : > { %v4635_v45 = vadd.f32 %v1769_v44, %v1761_v43 }
0x2071   : > { %3934 = vtanh.f32 %v4635_v45 }
0x207b   : > { %v3935_v46 = vpop.eup %3934 }
0x207c   : > { %1774 = vrot.lane.b32.xlu1 %v3935_v46, %s4170_s11 }
0x2080   : > { %466 = vperm.xlu1 %3837, %v4397_v9  }
0x2084   : > { %3838 = vset.pattern.permute.xlu1 %v4180_v34 }
0x20ee   : > { %v1775_v48 = vpop.permute.xlu1 %1774 }
0x20ef   : > { %v4640_v49 = vmul.f32 %v3933_v39, %v1775_v48 }
0x20f1   : > { %1789 = vrot.lane.b32.xlu0 %v4640_v49, %s4174_s21 }
0x20ff   : > { %v467_v52 = vpop.permute.xlu1 %466 }
0x2100   : > { %v469_v53 = vmul.f32 %v4412_v12, %v467_v52 }
0x2163   : > { %v1790_v50 = vpop.permute.xlu0 %1789 }
0x2164   : > { %v1792_v51 = vsel %vm582_vm1, %v1676_v27, %v1790_v50 }
0x2165   : > { %3534 = vmatmul.mubr.msk.f32.vlgmr.msra.gmra.mrb[12].mxu0 %vm475_vm2, %v1792_v51 }
0x2166   : > { %3704 = vmatpush3.bf16.msra.mxu0 %v4426_v31  ;;  %3558 = vmatprep.mubr.msk.f32.mxu0 %vm4166_vm0, %v4167_v2 }
0x2167   : > { %3705 = vmatprep.subr.bf16.mxu0 %v4165_v1 }
0x2238   : > { %v1862_v54 = vpop.f32.mrb[12].mxu0 }
0x2239   : > { %v1866_v56 = vadd.f32 %v4417_v13, %v1862_v54  ;;  %v3535_v57 = vpop.f32.mrb[13].mxu0 }
0x223b   : > { %v1867_v58 = vadd.f32 %v1866_v56, %v469_v53 }
0x223d   : > { %3936 = vtanh.f32 %v1867_v58  ;;  %v3294_v61 = vmul.f32 -1.442695, %v1867_v58 }
0x223f   : > { %3938 = vpow2.f32 %v3294_v61 }
0x2247   : > { %v3937_v59 = vpop.eup %3936 }
0x2248   : > { %1877 = vrot.lane.b32.xlu0 %v3937_v59, %s4169_s29 }
0x2249   : > { %v3939_v62 = vpop.eup %3938 }
0x224a   : > { %v1871_v63 = vadd.f32 1.0, %v3939_v62 }
0x224c   : > { %3940 = vrcp.f32 %v1871_v63 }
0x2256   : > { %v3941_v0 = vpop.eup %3940 }
0x2257   : > { %v1875_v5 = vmul.f32 %v3941_v0, %v4618_v22 }
0x22ba   : > { %v1878_v3 = vpop.permute.xlu0 %1877 }
0x22bb   : > { %v1880_v4 = vmul.f32 %v3941_v0, %v1878_v3 }
0x22bd   : > { %1882 = vrot.lane.b32.xlu1 %v1880_v4, %s4170_s11 }
0x232f   : > { %v1883_v6 = vpop.permute.xlu1 %1882 }
0x2330   : > { %v4655_v8 = vadd.f32 %v1883_v6, %v1875_v5 }
0x2332   : > { %3942 = vtanh.f32 %v4655_v8 }
0x233c   : > { %v3943_v11 = vpop.eup %3942 }
0x233d   : > { %1888 = vrot.lane.b32.xlu0 %v3943_v11, %s4170_s11 }
0x2341   : > { %1896 = vrot.lane.b32.xlu0 %v1862_v54, %s4171_s12 }
0x23af   : > { %v1889_v15 = vpop.permute.xlu0 %1888 }
0x23b0   : > { %v1891_v16 = vmul.f32 %v3941_v0, %v1889_v15 }
0x23b2   : > { %1893 = vrot.lane.b32.xlu1 %v1891_v16, %s4172_s13 }
0x23b3   : > { %v1897_v18 = vpop.permute.xlu0 %1896 }
0x2424   : > { %v1894_v17 = vpop.permute.xlu1 %1893 }
0x2425   : > { %3541 = vmatmul.mubr.msk.f32.vlgmr.msra.gmra.mrb[12].mxu1 %vm582_vm1, %v1894_v17 }
0x2426   : > { %3698 = vmatpush3.bf16.msra.mxu1 %v4392_v7  ;;  %3551 = vmatprep.mubr.msk.f32.mxu1 %vm4166_vm0, %v4167_v2 }
0x2427   : > { %3699 = vmatprep.subr.bf16.mxu1 %v4165_v1 }
0x242a   : > { %3701 = vmatpush3.bf16.msra.mxu1 %v4401_v10 }
0x242b   : > { %3711 = vmatprep.subr.bf16.mxu1 %v4165_v1 }
0x24f8   : > { %v1967_v19 = vpop.f32.mrb[12].mxu1 }
0x24f9   : > { %v1968_v20 = vadd.f32 %v1967_v19, %v1897_v18  ;;  %v3542_v21 = vpop.f32.mrb[13].mxu1 }
0x24fa   : > { %v394_v21 = vld [vmem:[#allocation3 + $0x10] sm:$0xff] }
0x24fb   : > { %v1971_v22 = vadd.f32 %v4445_v37, %v1968_v20  ;;  %v393_v20 = vld [vmem:[#allocation3 + $0x8] sm:$0xff] }
0x24fd   : > { %3944 = vtanh.f32 %v1971_v22  ;;  %v3296_v7 = vmul.f32 -1.442695, %v1971_v22 }
0x24ff   : > { %3946 = vpow2.f32 %v3296_v7 }
0x2507   : > { %v3945_v23 = vpop.eup %3944 }
0x2508   : > { %1981 = vrot.lane.b32.xlu1 %v3945_v23, %s4169_s29  ;;  %v395_v23 = vld [vmem:[#allocation3 + $0x18] sm:$0xff] }
0x2509   : > { %v3947_v24 = vpop.eup %3946  ;;  %v4711_v7 = vpack.c.bf16 %v395_v23, %v394_v21 }
0x250a   : > { %v1975_v25 = vadd.f32 1.0, %v3947_v24 }
0x250c   : > { %3948 = vrcp.f32 %v1975_v25 }
0x2516   : > { %v3949_v27 = vpop.eup %3948 }
0x2517   : > { %v1979_v29 = vmul.f32 %v3949_v27, %v4635_v45 }
0x257a   : > { %v1982_v28 = vpop.permute.xlu1 %1981 }
0x257b   : > { %v1984_v10 = vmul.f32 %v3949_v27, %v1982_v28 }
0x257d   : > { %1986 = vrot.lane.b32.xlu0 %v1984_v10, %s4170_s11 }
0x25ef   : > { %v1987_v30 = vpop.permute.xlu0 %1986 }
0x25f0   : > { %v4672_v32 = vadd.f32 %v1987_v30, %v1979_v29  ;;  %v4730_v29 = vld [vmem:[%s4941_s6] ss:$0 sm:$0xff] }
0x25f2   : > { %3950 = vtanh.f32 %v4672_v32 }
0x25fc   : > { %v3951_v33 = vpop.eup %3950 }
0x25fd   : > { %1992 = vrot.lane.b32.xlu1 %v3951_v33, %s4170_s11 }
0x2601   : > { %471 = vperm.xlu1 %3838, %v4397_v9  }
0x266f   : > { %v1993_v35 = vpop.permute.xlu1 %1992 }
0x2670   : > { %v4677_v36 = vmul.f32 %v3949_v27, %v1993_v35 }
0x2672   : > { %2007 = vrot.lane.b32.xlu0 %v4677_v36, %s4174_s21 }
0x2680   : > { %v472_v40 = vpop.permute.xlu1 %471 }
0x2681   : > { %v474_v9 = vmul.f32 %v4412_v12, %v472_v40 }
0x26e4   : > { %v2008_v38 = vpop.permute.xlu0 %2007 }
0x26e5   : > { %v2010_v39 = vsel %vm582_vm1, %v1894_v17, %v2008_v38 }
0x26e6   : > { %3552 = vmatmul.mubr.msk.f32.vlgmr.msra.gmra.mrb[14].mxu1 %vm475_vm2, %v2010_v39 }
0x26e7   : > { %3713 = vmatpush3.bf16.msra.mxu1 %v4426_v31  ;;  %3576 = vmatprep.mubr.msk.f32.mxu1 %vm4166_vm0, %v4167_v2 }
0x26e8   : > { %3714 = vmatprep.subr.bf16.mxu1 %v4165_v1 }
0x27b9   : > { %v2080_v42 = vpop.f32.mrb[14].mxu1 }
0x27ba   : > { %v2084_v43 = vadd.f32 %v4417_v13, %v2080_v42  ;;  %v3553_v44 = vpop.f32.mrb[15].mxu1 }
0x27bc   : > { %v2085_v45 = vadd.f32 %v2084_v43, %v474_v9 }
0x27be   : > { %3952 = vtanh.f32 %v2085_v45  ;;  %v3298_v47 = vmul.f32 -1.442695, %v2085_v45 }
0x27c0   : > { %3954 = vpow2.f32 %v3298_v47 }
0x27c8   : > { %v3953_v46 = vpop.eup %3952 }
0x27c9   : > { %2095 = vrot.lane.b32.xlu0 %v3953_v46, %s4169_s29 }
0x27ca   : > { %v3955_v48 = vpop.eup %3954 }
0x27cb   : > { %v2089_v50 = vadd.f32 1.0, %v3955_v48 }
0x27cd   : > { %3956 = vrcp.f32 %v2089_v50 }
0x27d7   : > { %v3957_v51 = vpop.eup %3956 }
0x27d8   : > { %v2093_v12 = vmul.f32 %v3957_v51, %v4655_v8 }
0x283b   : > { %v2096_v52 = vpop.permute.xlu0 %2095 }
0x283c   : > { %v2098_v53 = vmul.f32 %v3957_v51, %v2096_v52 }
0x283e   : > { %2100 = vrot.lane.b32.xlu1 %v2098_v53, %s4170_s11 }
0x28b0   : > { %v2101_v54 = vpop.permute.xlu1 %2100 }
0x28b1   : > { %v4692_v13 = vadd.f32 %v2101_v54, %v2093_v12  ;;  %v4752_v54 = vld [vmem:[%s4942_s7] ss:$0 sm:$0xff] }
0x28b3   : > { %3958 = vtanh.f32 %v4692_v13 }
0x28bd   : > { %v3959_v56 = vpop.eup %3958 }
0x28be   : > { %2106 = vrot.lane.b32.xlu0 %v3959_v56, %s4170_s11 }
0x28c2   : > { %2114 = vrot.lane.b32.xlu0 %v2080_v42, %s4171_s12 }
0x2930   : > { %v2107_v57 = vpop.permute.xlu0 %2106 }
0x2931   : > { %v2109_v58 = vmul.f32 %v3957_v51, %v2107_v57 }
0x2933   : > { %2111 = vrot.lane.b32.xlu1 %v2109_v58, %s4172_s13 }
0x2934   : > { %v2115_v61 = vpop.permute.xlu0 %2114 }
0x29a5   : > { %v2112_v59 = vpop.permute.xlu1 %2111 }
0x29a6   : > { %3559 = vmatmul.mubr.msk.f32.vlgmr.msra.gmra.mrb[14].mxu0 %vm582_vm1, %v2112_v59 }
0x29a7   : > { %3569 = vmatprep.mubr.msk.f32.mxu0 %vm4166_vm0, %v4167_v2 }
0x2a79   : > { %v2185_v62 = vpop.f32.mrb[14].mxu0 }
0x2a7a   : > { %v2186_v63 = vadd.f32 %v2185_v62, %v2115_v61  ;;  %v3560_v0 = vpop.f32.mrb[15].mxu0 }
0x2a7c   : > { %v2189_v3 = vadd.f32 %v4445_v37, %v2186_v63  ;;  %v392_v37 = vld [vmem:[#allocation3] sm:$0xff] }
0x2a7d   : > { %v4708_v22 = vpack.c.bf16 %v393_v20, %v392_v37 }
0x2a7e   : > { %3960 = vtanh.f32 %v2189_v3  ;;  %v3300_v5 = vmul.f32 -1.442695, %v2189_v3 }
0x2a7f   : > { %3707 = vmatpush3.bf16.msra.mxu0 %v4708_v22 }
0x2a80   : > { %3962 = vpow2.f32 %v3300_v5  ;;  %3708 = vmatprep.subr.bf16.mxu0 %v4165_v1 }
0x2a83   : > { %3710 = vmatpush3.bf16.msra.mxu0 %v4711_v7 }
0x2a84   : > { %3720 = vmatprep.subr.bf16.mxu0 %v4165_v1 }
0x2a88   : > { %v3961_v4 = vpop.eup %3960 }
0x2a89   : > { %2199 = vrot.lane.b32.xlu1 %v3961_v4, %s4169_s29 }
0x2a8a   : > { %v3963_v6 = vpop.eup %3962 }
0x2a8b   : > { %v2193_v8 = vadd.f32 1.0, %v3963_v6 }
0x2a8d   : > { %3964 = vrcp.f32 %v2193_v8 }
0x2a97   : > { %v3965_v11 = vpop.eup %3964 }
0x2a98   : > { %v2197_v17 = vmul.f32 %v3965_v11, %v4672_v32 }
0x2afb   : > { %v2200_v15 = vpop.permute.xlu1 %2199 }
0x2afc   : > { %v2202_v16 = vmul.f32 %v3965_v11, %v2200_v15 }
0x2afe   : > { %2204 = vrot.lane.b32.xlu0 %v2202_v16, %s4170_s11 }
0x2b70   : > { %v2205_v18 = vpop.permute.xlu0 %2204 }
0x2b71   : > { %v4705_v19 = vadd.f32 %v2205_v18, %v2197_v17 }
0x2b73   : > { %3966 = vtanh.f32 %v4705_v19 }
0x2b7d   : > { %v3967_v24 = vpop.eup %3966 }
0x2b7e   : > { %2210 = vrot.lane.b32.xlu1 %v3967_v24, %s4170_s11 }
0x2bf0   : > { %v2211_v25 = vpop.permute.xlu1 %2210 }
0x2bf1   : > { %v4717_v27 = vmul.f32 %v3965_v11, %v2211_v25 }
0x2bf3   : > { %2225 = vrot.lane.b32.xlu0 %v4717_v27, %s4174_s21 }
0x2c65   : > { %v2226_v28 = vpop.permute.xlu0 %2225 }
0x2c66   : > { %v2228_v10 = vsel %vm582_vm1, %v2112_v59, %v2226_v28 }
0x2c67   : > { %3570 = vmatmul.mubr.msk.f32.vlgmr.msra.gmra.mrb[16].mxu0 %vm475_vm2, %v2228_v10 }
0x2c68   : > { %3722 = vmatpush3.bf16.msra.mxu0 %v4426_v31  ;;  %3594 = vmatprep.mubr.msk.f32.mxu0 %vm4166_vm0, %v4167_v2 }
0x2c69   : > { %3723 = vmatprep.subr.bf16.mxu0 %v4165_v1 }
0x2d3a   : > { %v2298_v30 = vpop.f32.mrb[16].mxu0 }
0x2d3b   : > { %v2302_v32 = vadd.f32 %v4730_v29, %v2298_v30  ;;  %v3571_v33 = vpop.f32.mrb[17].mxu0 }
0x2d3d   : > { %3968 = vtanh.f32 %v2302_v32  ;;  %v3302_v35 = vmul.f32 -1.442695, %v2302_v32 }
0x2d3f   : > { %3970 = vpow2.f32 %v3302_v35 }
0x2d47   : > { %v3969_v34 = vpop.eup %3968 }
0x2d48   : > { %2312 = vrot.lane.b32.xlu1 %v3969_v34, %s4169_s29 }
0x2d49   : > { %v3971_v38 = vpop.eup %3970 }
0x2d4a   : > { %v2306_v39 = vadd.f32 1.0, %v3971_v38 }
0x2d4c   : > { %3972 = vrcp.f32 %v2306_v39 }
0x2d56   : > { %v3973_v40 = vpop.eup %3972 }
0x2d57   : > { %v2310_v43 = vmul.f32 %v3973_v40, %v4692_v13 }
0x2dba   : > { %v2313_v9 = vpop.permute.xlu1 %2312 }
0x2dbb   : > { %v2315_v42 = vmul.f32 %v3973_v40, %v2313_v9 }
0x2dbd   : > { %2317 = vrot.lane.b32.xlu0 %v2315_v42, %s4170_s11 }
0x2e2f   : > { %v2318_v44 = vpop.permute.xlu0 %2317 }
0x2e30   : > { %v4736_v45 = vadd.f32 %v2318_v44, %v2310_v43 }
0x2e32   : > { %3974 = vtanh.f32 %v4736_v45 }
0x2e3c   : > { %v3975_v46 = vpop.eup %3974 }
0x2e3d   : > { %2323 = vrot.lane.b32.xlu1 %v3975_v46, %s4170_s11 }
0x2e41   : > { %2331 = vrot.lane.b32.xlu1 %v2298_v30, %s4171_s12 }
0x2eaf   : > { %v2324_v47 = vpop.permute.xlu1 %2323 }
0x2eb0   : > { %v2326_v48 = vmul.f32 %v3973_v40, %v2324_v47 }
0x2eb2   : > { %2328 = vrot.lane.b32.xlu0 %v2326_v48, %s4172_s13 }
0x2eb3   : > { %v2332_v51 = vpop.permute.xlu1 %2331 }
0x2f24   : > { %v2329_v50 = vpop.permute.xlu0 %2328 }
0x2f25   : > { %3577 = vmatmul.mubr.msk.f32.vlgmr.msra.gmra.mrb[16].mxu1 %vm582_vm1, %v2329_v50 }
0x2f26   : > { %3716 = vmatpush3.bf16.msra.mxu1 %v4708_v22  ;;  %3587 = vmatprep.mubr.msk.f32.mxu1 %vm4166_vm0, %v4167_v2 }
0x2f27   : > { %3717 = vmatprep.subr.bf16.mxu1 %v4165_v1 }
0x2f2a   : > { %3719 = vmatpush3.bf16.msra.mxu1 %v4711_v7 }
0x2f2b   : > { %3729 = vmatprep.subr.bf16.mxu1 %v4165_v1 }
0x2ff8   : > { %v2402_v52 = vpop.f32.mrb[16].mxu1 }
0x2ff9   : > { %v2403_v53 = vadd.f32 %v2402_v52, %v2332_v51  ;;  %v3578_v12 = vpop.f32.mrb[17].mxu1 }
0x2ffb   : > { %v2406_v13 = vadd.f32 %v4752_v54, %v2403_v53 }
0x2ffd   : > { %3976 = vtanh.f32 %v2406_v13  ;;  %v3304_v57 = vmul.f32 -1.442695, %v2406_v13 }
0x2fff   : > { %3978 = vpow2.f32 %v3304_v57 }
0x3007   : > { %v3977_v56 = vpop.eup %3976 }
0x3008   : > { %2416 = vrot.lane.b32.xlu0 %v3977_v56, %s4169_s29 }
0x3009   : > { %v3979_v58 = vpop.eup %3978 }
0x300a   : > { %v2410_v59 = vadd.f32 1.0, %v3979_v58 }
0x300c   : > { %3980 = vrcp.f32 %v2410_v59 }
0x3016   : > { %v3981_v61 = vpop.eup %3980 }
0x3017   : > { %v2414_v0 = vmul.f32 %v3981_v61, %v4705_v19 }
0x307a   : > { %v2417_v62 = vpop.permute.xlu0 %2416 }
0x307b   : > { %v2419_v63 = vmul.f32 %v3981_v61, %v2417_v62 }
0x307d   : > { %2421 = vrot.lane.b32.xlu1 %v2419_v63, %s4170_s11 }
0x30ef   : > { %v2422_v3 = vpop.permute.xlu1 %2421 }
0x30f0   : > { %v2424_v4 = vadd.f32 %v2422_v3, %v2414_v0 }
0x30f2   : > { %3982 = vtanh.f32 %v2424_v4 }
0x30fc   : > { %v3983_v5 = vpop.eup %3982 }
0x30fd   : > { %2427 = vrot.lane.b32.xlu0 %v3983_v5, %s4170_s11 }
0x316f   : > { %v2428_v6 = vpop.permute.xlu0 %2427 }
0x3170   : > { %v4759_v8 = vmul.f32 %v3981_v61, %v2428_v6 }
0x3172   : > { %2442 = vrot.lane.b32.xlu1 %v4759_v8, %s4174_s21 }
0x31e4   : > { %v2443_v11 = vpop.permute.xlu1 %2442 }
0x31e5   : > { %v2445_v15 = vsel %vm582_vm1, %v2329_v50, %v2443_v11 }
0x31e6   : > { %3588 = vmatmul.mubr.msk.f32.vlgmr.msra.gmra.mrb[18].mxu1 %vm475_vm2, %v2445_v15 }
0x31e7   : > { %3731 = vmatpush3.bf16.msra.mxu1 %v4426_v31  ;;  %3612 = vmatprep.mubr.msk.f32.mxu1 %vm4166_vm0, %v4167_v2 }
0x31e8   : > { %3732 = vmatprep.subr.bf16.mxu1 %v4165_v1 }
0x32b9   : > { %v2515_v16 = vpop.f32.mrb[18].mxu1 }
0x32ba   : > { %v2519_v17 = vadd.f32 %v4730_v29, %v2515_v16  ;;  %v3589_v18 = vpop.f32.mrb[19].mxu1 }
0x32bc   : > { %3984 = vtanh.f32 %v2519_v17  ;;  %v3306_v37 = vmul.f32 -1.442695, %v2519_v17 }
0x32be   : > { %3986 = vpow2.f32 %v3306_v37 }
0x32c6   : > { %v3985_v19 = vpop.eup %3984 }
0x32c7   : > { %2529 = vrot.lane.b32.xlu0 %v3985_v19, %s4169_s29 }
0x32c8   : > { %v3987_v20 = vpop.eup %3986 }
0x32c9   : > { %v2523_v21 = vadd.f32 1.0, %v3987_v20 }
0x32cb   : > { %3988 = vrcp.f32 %v2523_v21 }
0x32d5   : > { %v3989_v23 = vpop.eup %3988 }
0x32d6   : > { %v2527_v28 = vmul.f32 %v3989_v23, %v4736_v45 }
0x3339   : > { %v2530_v24 = vpop.permute.xlu0 %2529 }
0x333a   : > { %v2532_v25 = vmul.f32 %v3989_v23, %v2530_v24 }
0x333c   : > { %2534 = vrot.lane.b32.xlu1 %v2532_v25, %s4170_s11 }
0x33ae   : > { %v2535_v10 = vpop.permute.xlu1 %2534 }
0x33af   : > { %v2537_v30 = vadd.f32 %v2535_v10, %v2527_v28 }
0x33b1   : > { %3990 = vtanh.f32 %v2537_v30 }
0x33bb   : > { %v3991_v32 = vpop.eup %3990 }
0x33bc   : > { %2540 = vrot.lane.b32.xlu0 %v3991_v32, %s4170_s11 }
0x33c0   : > { %2548 = vrot.lane.b32.xlu0 %v2515_v16, %s4171_s12 }
0x342e   : > { %v2541_v33 = vpop.permute.xlu0 %2540 }
0x342f   : > { %v2543_v34 = vmul.f32 %v3989_v23, %v2541_v33 }
0x3431   : > { %2545 = vrot.lane.b32.xlu1 %v2543_v34, %s4172_s13 }
0x3432   : > { %v2549_v38 = vpop.permute.xlu0 %2548 }
0x34a3   : > { %v2546_v35 = vpop.permute.xlu1 %2545 }
0x34a4   : > { %3595 = vmatmul.mubr.msk.f32.vlgmr.msra.gmra.mrb[18].mxu0 %vm582_vm1, %v2546_v35 }
0x34a5   : > { %3725 = vmatpush3.bf16.msra.mxu0 %v4708_v22  ;;  %3605 = vmatprep.mubr.msk.f32.mxu0 %vm4166_vm0, %v4167_v2 }
0x34a6   : > { %3726 = vmatprep.subr.bf16.mxu0 %v4165_v1 }
0x34a9   : > { %3728 = vmatpush3.bf16.msra.mxu0 %v4711_v7 }
0x34aa   : > { %3738 = vmatprep.subr.bf16.mxu0 %v4165_v1 }
0x3577   : > { %v2619_v39 = vpop.f32.mrb[18].mxu0 }
0x3578   : > { %v2620_v40 = vadd.f32 %v2619_v39, %v2549_v38  ;;  %v3596_v9 = vpop.f32.mrb[19].mxu0 }
0x357a   : > { %v2623_v42 = vadd.f32 %v4752_v54, %v2620_v40 }
0x357c   : > { %3992 = vtanh.f32 %v2623_v42  ;;  %v3308_v44 = vmul.f32 -1.442695, %v2623_v42 }
0x357e   : > { %3994 = vpow2.f32 %v3308_v44 }
0x3586   : > { %v3993_v43 = vpop.eup %3992 }
0x3587   : > { %2633 = vrot.lane.b32.xlu1 %v3993_v43, %s4169_s29 }
0x3588   : > { %v3995_v45 = vpop.eup %3994 }
0x3589   : > { %v2627_v46 = vadd.f32 1.0, %v3995_v45 }
0x358b   : > { %3996 = vrcp.f32 %v2627_v46 }
0x3595   : > { %v3997_v47 = vpop.eup %3996 }
0x3596   : > { %v2631_v51 = vmul.f32 %v3997_v47, %v2424_v4 }
0x35f9   : > { %v2634_v48 = vpop.permute.xlu1 %2633 }
0x35fa   : > { %v2636_v50 = vmul.f32 %v3997_v47, %v2634_v48 }
0x35fc   : > { %2638 = vrot.lane.b32.xlu0 %v2636_v50, %s4170_s11 }
0x366e   : > { %v2639_v52 = vpop.permute.xlu0 %2638 }
0x366f   : > { %v2641_v53 = vadd.f32 %v2639_v52, %v2631_v51 }
0x3671   : > { %3998 = vtanh.f32 %v2641_v53 }
0x367b   : > { %v3999_v12 = vpop.eup %3998 }
0x367c   : > { %2644 = vrot.lane.b32.xlu1 %v3999_v12, %s4170_s11 }
0x36ee   : > { %v2645_v13 = vpop.permute.xlu1 %2644 }
0x36ef   : > { %v4787_v56 = vmul.f32 %v3997_v47, %v2645_v13 }
0x36f1   : > { %2659 = vrot.lane.b32.xlu0 %v4787_v56, %s4174_s21 }
0x3763   : > { %v2660_v57 = vpop.permute.xlu0 %2659 }
0x3764   : > { %v2662_v58 = vsel %vm582_vm1, %v2546_v35, %v2660_v57  ;;  %v3272_v57 = vld [vmem:[%s4943_s8] ss:$0 sm:$0xff] }
0x3765   : > { %3606 = vmatmul.mubr.msk.f32.vlgmr.msra.gmra.mrb[20].mxu0 %vm475_vm2, %v2662_v58 }
0x3766   : > { %3740 = vmatpush3.bf16.msra.mxu0 %v4426_v31  ;;  %3630 = vmatprep.mubr.msk.f32.mxu0 %vm4166_vm0, %v4167_v2 }
0x3838   : > { %v2732_v59 = vpop.f32.mrb[20].mxu0 }
0x3839   : > { %v2736_v61 = vadd.f32 %v4730_v29, %v2732_v59  ;;  %v3607_v62 = vpop.f32.mrb[21].mxu0 }
0x383b   : > { %4000 = vtanh.f32 %v2736_v61  ;;  %v3310_v0 = vmul.f32 -1.442695, %v2736_v61 }
0x383d   : > { %4002 = vpow2.f32 %v3310_v0 }
0x3845   : > { %v4001_v63 = vpop.eup %4000 }
0x3846   : > { %2746 = vrot.lane.b32.xlu1 %v4001_v63, %s4169_s29 }
0x3847   : > { %v4003_v3 = vpop.eup %4002 }
0x3848   : > { %v2740_v4 = vadd.f32 1.0, %v4003_v3 }
0x384a   : > { %4004 = vrcp.f32 %v2740_v4 }
0x3854   : > { %v4005_v5 = vpop.eup %4004 }
0x3855   : > { %v2744_v31 = vmul.f32 %v4005_v5, %v2537_v30 }
0x38b8   : > { %v2747_v6 = vpop.permute.xlu1 %2746 }
0x38b9   : > { %v2749_v11 = vmul.f32 %v4005_v5, %v2747_v6 }
0x38bb   : > { %2751 = vrot.lane.b32.xlu0 %v2749_v11, %s4170_s11 }
0x392d   : > { %v2752_v15 = vpop.permute.xlu0 %2751 }
0x392e   : > { %v2754_v16 = vadd.f32 %v2752_v15, %v2744_v31 }
0x3930   : > { %4006 = vtanh.f32 %v2754_v16 }
0x393a   : > { %v4007_v17 = vpop.eup %4006 }
0x393b   : > { %2757 = vrot.lane.b32.xlu1 %v4007_v17, %s4170_s11 }
0x393f   : > { %2765 = vrot.lane.b32.xlu1 %v2732_v59, %s4171_s12 }
0x39ad   : > { %v2758_v18 = vpop.permute.xlu1 %2757 }
0x39ae   : > { %v2760_v19 = vmul.f32 %v4005_v5, %v2758_v18 }
0x39b0   : > { %2762 = vrot.lane.b32.xlu0 %v2760_v19, %s4172_s13 }
0x39b1   : > { %v2766_v20 = vpop.permute.xlu1 %2765 }
0x3a22   : > { %v2763_v37 = vpop.permute.xlu0 %2762 }
0x3a23   : > { %3613 = vmatmul.mubr.msk.f32.vlgmr.msra.gmra.mrb[20].mxu1 %vm582_vm1, %v2763_v37 }
0x3a24   : > { %3734 = vmatpush3.bf16.msra.mxu1 %v4708_v22  ;;  %3623 = vmatprep.mubr.msk.f32.mxu1 %vm4166_vm0, %v4167_v2 }
0x3a25   : > { %3735 = vmatprep.subr.bf16.mxu1 %v4165_v1 }
0x3a28   : > { %3737 = vmatpush3.bf16.msra.mxu1 %v4711_v7 }
0x3af6   : > { %v2836_v21 = vpop.f32.mrb[20].mxu1 }
0x3af7   : > { %v2837_v23 = vadd.f32 %v2836_v21, %v2766_v20  ;;  %v3614_v24 = vpop.f32.mrb[21].mxu1 }
0x3af9   : > { %v2840_v25 = vadd.f32 %v4752_v54, %v2837_v23 }
0x3afb   : > { %4008 = vtanh.f32 %v2840_v25  ;;  %v3312_v10 = vmul.f32 -1.442695, %v2840_v25 }
0x3afd   : > { %4010 = vpow2.f32 %v3312_v10 }
0x3b05   : > { %v4009_v28 = vpop.eup %4008 }
0x3b06   : > { %2850 = vrot.lane.b32.xlu0 %v4009_v28, %s4169_s29 }
0x3b07   : > { %v4011_v22 = vpop.eup %4010 }
0x3b08   : > { %v2844_v30 = vadd.f32 1.0, %v4011_v22 }
0x3b0a   : > { %4012 = vrcp.f32 %v2844_v30 }
0x3b14   : > { %v4013_v2 = vpop.eup %4012 }
0x3b15   : > { %v2848_v7 = vmul.f32 %v4013_v2, %v2641_v53 }
0x3b78   : > { %v2851_v32 = vpop.permute.xlu0 %2850 }
0x3b79   : > { %v2853_v1 = vmul.f32 %v4013_v2, %v2851_v32 }
0x3b7b   : > { %2855 = vrot.lane.b32.xlu1 %v2853_v1, %s4170_s11 }
0x3bed   : > { %v2856_v33 = vpop.permute.xlu1 %2855 }
0x3bee   : > { %v4811_v34 = vadd.f32 %v2856_v33, %v2848_v7 }
0x3bf0   : > { %4014 = vtanh.f32 %v4811_v34 }
0x3bfa   : > { %v4015_v35 = vpop.eup %4014 }
0x3bfb   : > { %2861 = vrot.lane.b32.xlu0 %v4015_v35, %s4170_s11 }
0x3c6d   : > { %v2862_v38 = vpop.permute.xlu0 %2861 }
0x3c6e   : > { %v4815_v39 = vmul.f32 %v4013_v2, %v2862_v38 }
0x3c70   : > { %2876 = vrot.lane.b32.xlu1 %v4815_v39, %s4174_s21  ;;  %s4189_s21 = smov 7  }
0x3ce2   : > { %v2877_v40 = vpop.permute.xlu1 %2876 }
0x3ce3   : > { %v2879_v9 = vsel %vm582_vm1, %v2763_v37, %v2877_v40 }
0x3ce4   : > { %3624 = vmatmul.mubr.msk.f32.vlgmr.msra.gmra.mrb[22].mxu1 %vm475_vm2, %v2879_v9 }
0x3db7   : > { %v2949_v42 = vpop.f32.mrb[22].mxu1 }
0x3db8   : > { %v2953_v43 = vadd.f32 %v4730_v29, %v2949_v42  ;;  %v3625_v44 = vpop.f32.mrb[23].mxu1 }
0x3dba   : > { %4016 = vtanh.f32 %v2953_v43  ;;  %v3314_v46 = vmul.f32 -1.442695, %v2953_v43 }
0x3dbc   : > { %4018 = vpow2.f32 %v3314_v46 }
0x3dc4   : > { %v4017_v45 = vpop.eup %4016 }
0x3dc5   : > { %2963 = vrot.lane.b32.xlu0 %v4017_v45, %s4169_s29 }
0x3dc6   : > { %v4019_v47 = vpop.eup %4018 }
0x3dc7   : > { %v2957_v48 = vadd.f32 1.0, %v4019_v47 }
0x3dc9   : > { %4020 = vrcp.f32 %v2957_v48 }
0x3dd3   : > { %v4021_v50 = vpop.eup %4020 }
0x3dd4   : > { %v2961_v53 = vmul.f32 %v4021_v50, %v2754_v16 }
0x3e37   : > { %v2964_v51 = vpop.permute.xlu0 %2963 }
0x3e38   : > { %v2966_v52 = vmul.f32 %v4021_v50, %v2964_v51 }
0x3e3a   : > { %2968 = vrot.lane.b32.xlu1 %v2966_v52, %s4170_s11 }
0x3eac   : > { %v2969_v12 = vpop.permute.xlu1 %2968 }
0x3ead   : > { %v2971_v13 = vadd.f32 %v2969_v12, %v2961_v53 }
0x3eaf   : > { %4022 = vtanh.f32 %v2971_v13 }
0x3eb9   : > { %v4023_v29 = vpop.eup %4022 }
0x3eba   : > { %2974 = vrot.lane.b32.xlu0 %v4023_v29, %s4170_s11  ;;  %v3267_v29 = vld [vmem:[#allocation2] ss:$0 sm:$0xff] }
0x3ebe   : > { %2982 = vrot.lane.b32.xlu0 %v2949_v42, %s4171_s12  ;;  %s4185_s12 = smov 1  }
0x3ec2   : > { %685 = vrot.lane.b32.xlu0 %v3272_v57, %s4181_s23  ;;  %s382_s23 = scalar_lea.vmem [#allocation8], %s3262_s17 }
0x3f2c   : > { %v2975_v58 = vpop.permute.xlu0 %2974 }
0x3f2d   : > { %v2977_v59 = vmul.f32 %v4021_v50, %v2975_v58 }
0x3f2f   : > { %2979 = vrot.lane.b32.xlu1 %v2977_v59, %s4172_s13 }
0x3f30   : > { %v2983_v62 = vpop.permute.xlu0 %2982 }
0x3f34   : > { %v4832_v6 = vpop.permute.xlu0 %685 }
0x3f35   : > { %v688_v11 = vmul.f32 %v4832_v6, %v4455_v55  ;;  %v906_v31 = vmul.f32 %v4492_v41, %v4832_v6  ;;  %v1124_v20 = vmul.f32 %v4529_v26, %v4832_v6  ;;  %v1342_v26 = vmul.f32 %v4566_v14, %v4832_v6 }
0x3f36   : > { %v1560_v30 = vmul.f32 %v4603_v60, %v4832_v6  ;;  %v1996_v14 = vmul.f32 %v4677_v36, %v4832_v6  ;;  %v1778_v60 = vmul.f32 %v4640_v49, %v4832_v6  ;;  %v2214_v38 = vmul.f32 %v4717_v27, %v4832_v6 }
0x3f37   : > { %v2431_v40 = vmul.f32 %v4759_v8, %v4832_v6  ;;  %v2648_v36 = vmul.f32 %v4787_v56, %v4832_v6  ;;  %v2865_v52 = vmul.f32 %v4815_v39, %v4832_v6 }
0x3fa1   : > { %v2980_v61 = vpop.permute.xlu1 %2979 }
0x3fa2   : > { %3631 = vmatmul.mubr.msk.f32.vlgmr.msra.gmra.mrb[22].mxu0 %vm582_vm1, %v2980_v61 }
0x4075   : > { %v3053_v63 = vpop.f32.mrb[22].mxu0 }
0x4076   : > { %v3054_v0 = vadd.f32 %v3053_v63, %v2983_v62  ;;  %v3632_v3 = vpop.f32.mrb[23].mxu0 }
0x4078   : > { %v3057_v4 = vadd.f32 %v4752_v54, %v3054_v0 }
0x407a   : > { %4024 = vtanh.f32 %v3057_v4  ;;  %v3316_v15 = vmul.f32 -1.442695, %v3057_v4 }
0x407c   : > { %4026 = vpow2.f32 %v3316_v15 }
0x4084   : > { %v4025_v5 = vpop.eup %4024 }
0x4085   : > { %3067 = vrot.lane.b32.xlu1 %v4025_v5, %s4169_s29  ;;  %s4183_s29 = smov 6  }
0x4086   : > { %v4027_v16 = vpop.eup %4026 }
0x4087   : > { %v3061_v54 = vadd.f32 1.0, %v4027_v16 }
0x4089   : > { %690 = vrot.lane.b32.xlu1 %v688_v11, %s4172_s13  ;;  %4028 = vrcp.f32 %v3061_v54 }
0x408d   : > { %908 = vrot.lane.b32.xlu1 %v906_v31, %s4172_s13 }
0x4093   : > { %v4029_v17 = vpop.eup %4028 }
0x4094   : > { %v3065_v10 = vmul.f32 %v4029_v17, %v4811_v34 }
0x40f7   : > { %v3068_v18 = vpop.permute.xlu1 %3067 }
0x40f8   : > { %v3070_v19 = vmul.f32 %v4029_v17, %v3068_v18 }
0x40fa   : > { %3072 = vrot.lane.b32.xlu1 %v3070_v19, %s4170_s11 }
0x40fb   : > { %v691_v37 = vpop.permute.xlu1 %690 }
0x40fc   : > { %v693_v55 = vsel %vm582_vm1, %v691_v37, 0.0 }
0x40fd   : > { %694 = vadd.xlane.f32.xlu0 %v693_v55 }
0x40ff   : > { %v909_v41 = vpop.permute.xlu1 %908 }
0x4100   : > { %v911_v21 = vsel %vm582_vm1, %v909_v41, 0.0 }
0x4113   : > { %1126 = vrot.lane.b32.xlu0 %v1124_v20, %s4172_s13 }
0x411e   : > { %912 = vadd.xlane.f32.xlu1 %v911_v21 }
0x416c   : > { %v3073_v28 = vpop.permute.xlu1 %3072 }
0x416d   : > { %v3075_v22 = vadd.f32 %v3073_v28, %v3065_v10 }
0x416f   : > { %4030 = vtanh.f32 %v3075_v22 }
0x4179   : > { %v4031_v2 = vpop.eup %4030 }
0x418a   : > { %v4847_v23 = vpop.xlane.xlu0 %694 }
0x418b   : > { %v696_v41 = vadd.f32 %v3267_v29, %v4847_v23 }
0x418e   : > { %v1127_v24 = vpop.permute.xlu0 %1126 }
0x418f   : > { %v1129_v25 = vsel %vm582_vm1, %v1127_v24, 0.0 }
0x4190   : > { %1130 = vadd.xlane.f32.xlu1 %v1129_v25 }
0x41a1   : > { %1344 = vrot.lane.b32.xlu1 %v1342_v26, %s4172_s13 }
0x41a5   : > { %1562 = vrot.lane.b32.xlu1 %v1560_v30, %s4172_s13 }
0x41a9   : > { %3078 = vrot.lane.b32.xlu1 %v4031_v2, %s4170_s11  ;;  %s4184_s11 = smov 8  }
0x41ab   : > { %v913_v32 = vpop.xlane.xlu1 %912 }
0x41ac   : > { %v914_v3 = vadd.f32 %v3267_v29, %v913_v32 }
0x421d   : > { %v1131_v1 = vpop.xlane.xlu1 %1130 }
0x421e   : > { %v1132_v57 = vadd.f32 %v3267_v29, %v1131_v1 }
0x4221   : > { %v1345_v7 = vpop.permute.xlu1 %1344 }
0x4222   : > { %v1347_v33 = vsel %vm582_vm1, %v1345_v7, 0.0 }
0x4223   : > { %1348 = vadd.xlane.f32.xlu0 %v1347_v33 }
0x4225   : > { %v1563_v34 = vpop.permute.xlu1 %1562 }
0x4226   : > { %v1565_v35 = vsel %vm582_vm1, %v1563_v34, 0.0 }
0x4227   : > { %1566 = vadd.xlane.f32.xlu1 %v1565_v35 }
0x4229   : > { %v3079_v9 = vpop.permute.xlu1 %3078 }
0x422a   : > { %v3081_v42 = vmul.f32 %v4029_v17, %v3079_v9 }
0x422c   : > { %v3082_v49 = vmul.f32 %v3081_v42, %v4832_v6 }
0x4238   : > { %1998 = vrot.lane.b32.xlu1 %v1996_v14, %s4172_s13 }
0x4239   : > { %1780 = vrot.lane.b32.xlu0 %v1778_v60, %s4172_s13 }
0x423c   : > { %2216 = vrot.lane.b32.xlu1 %v2214_v38, %s4172_s13 }
0x4240   : > { %2433 = vrot.lane.b32.xlu1 %v2431_v40, %s4172_s13 }
0x4244   : > { %2650 = vrot.lane.b32.xlu1 %v2648_v36, %s4172_s13 }
0x4248   : > { %3084 = vrot.lane.b32.xlu1 %v3082_v49, %s4172_s13 }
0x42b0   : > { %v1349_v43 = vpop.xlane.xlu0 %1348 }
0x42b1   : > { %v1350_v4 = vadd.f32 %v3267_v29, %v1349_v43 }
0x42b4   : > { %v1781_v27 = vpop.permute.xlu0 %1780  ;;  %v1567_v44 = vpop.xlane.xlu1 %1566 }
0x42b5   : > { %v1783_v45 = vsel %vm582_vm1, %v1781_v27, 0.0  ;;  %v1568_v5 = vadd.f32 %v3267_v29, %v1567_v44 }
0x42b6   : > { %1784 = vadd.xlane.f32.xlu0 %v1783_v45 }
0x42b8   : > { %v1999_v8 = vpop.permute.xlu1 %1998 }
0x42b9   : > { %v2001_v46 = vsel %vm582_vm1, %v1999_v8, 0.0 }
0x42ba   : > { %2002 = vadd.xlane.f32.xlu1 %v2001_v46 }
0x42bc   : > { %v2217_v47 = vpop.permute.xlu1 %2216 }
0x42bd   : > { %v2219_v53 = vsel %vm582_vm1, %v2217_v47, 0.0 }
0x42c0   : > { %v2434_v48 = vpop.permute.xlu1 %2433 }
0x42c1   : > { %v2436_v56 = vsel %vm582_vm1, %v2434_v48, 0.0 }
0x42c2   : > { %2437 = vadd.xlane.f32.xlu1 %v2436_v56 }
0x42c4   : > { %v2651_v50 = vpop.permute.xlu1 %2650 }
0x42c5   : > { %v2653_v51 = vsel %vm582_vm1, %v2651_v50, 0.0 }
0x42c6   : > { %2654 = vadd.xlane.f32.xlu1 %v2653_v51 }
0x42c8   : > { %v3085_v12 = vpop.permute.xlu1 %3084 }
0x42c9   : > { %v3087_v13 = vsel %vm582_vm1, %v3085_v12, 0.0 }
0x42cc   : > { %2867 = vrot.lane.b32.xlu0 %v2865_v52, %s4172_s13  ;;  %s4186_s13 = smov 3  }
0x42eb   : > { %2220 = vadd.xlane.f32.xlu0 %v2219_v53 }
0x42ef   : > { %3088 = vadd.xlane.f32.xlu0 %v3087_v13 }
0x4305   : > { %3096 = vrot.lane.b32.xlu0 %v1132_v57, %s4182_s26  ;;  %s3173_s26 = sshll.u32 %s382_s23, 4  ;;  %s4895_s26 = int_to_ptr.vmem [resolvable:$true] %s3173_s26 }
0x4343   : > { %v1785_v58 = vpop.xlane.xlu0 %1784 }
0x4344   : > { %v1786_v6 = vadd.f32 %v3267_v29, %v1785_v58 }
0x4347   : > { %v2868_v59 = vpop.permute.xlu0 %2867  ;;  %v2003_v61 = vpop.xlane.xlu1 %2002 }
0x4348   : > { %v2870_v62 = vsel %vm582_vm1, %v2868_v59, 0.0  ;;  %v2004_v63 = vadd.f32 %v3267_v29, %v2003_v61 }
0x4349   : > { %2871 = vadd.xlane.f32.xlu1 %v2870_v62 }
0x434a   : > { %3112 = vrot.lane.b32.xlu0 %v2004_v63, %s4183_s29 }
0x434f   : > { %v2438_v39 = vpop.xlane.xlu1 %2437 }
0x4350   : > { %v2439_v0 = vadd.f32 %v3267_v29, %v2438_v39 }
0x4352   : > { %3120 = vrot.lane.b32.xlu0 %v2439_v0, %s4184_s11 }
0x4353   : > { %v2655_v15 = vpop.xlane.xlu1 %2654 }
0x4354   : > { %v2656_v16 = vadd.f32 %v3267_v29, %v2655_v15 }
0x435a   : > { %3092 = vrot.lane.b32.xlu1 %v914_v3, %s4185_s12  ;;  %s4893_s12 = scalar_lea.hbm %s4945_s10, %s3318_s20 }
0x435e   : > { %3100 = vrot.lane.b32.xlu1 %v1350_v4, %s4186_s13  ;;  %s4089_s13 = scalar_lea.vmem %s4895_s26, 128 }
0x435f   : > { %p4090_p10 = scmp.ne.s32.totalorder %s4895_s26, %s4089_s13 }
0x4361   : > { %p4091_p2 = pnand %p4090_p10, %p4964_p1 }
0x4362   : > { %3104 = vrot.lane.b32.xlu1 %v1568_v5, %s4187_s14  ;;  %s4193_s14 = smov [#allocation8]  }
0x4363   : > { %p4092_p3 = pneg %p4091_p2 }
0x4366   : > { %3108 = vrot.lane.b32.xlu1 %v1786_v6, %s4188_s19  ;;  %s4093_s19 = sshll.u32 %s4193_s14, 4  ;;  %s4094_s19 = int_to_ptr.vmem [resolvable:$false] %s4093_s19 }
0x4367   : > { %p4096_p4 = scmp.lt.s32.totalorder %s4895_s26, %s4094_s19 }
0x4378   : > { %v2221_v11 = vpop.xlane.xlu0 %2220 }
0x4379   : > { %v2222_v31 = vadd.f32 %v3267_v29, %v2221_v11 }
0x437b   : > { %3116 = vrot.lane.b32.xlu1 %v2222_v31, %s4189_s21  ;;  %s4095_s21 = scalar_lea.vmem %s4094_s19, 256 }
0x437c   : > { %v3089_v54 = vpop.xlane.xlu0 %3088  ;;  %p4097_p7 = scmp.lt.s32.totalorder %s4095_s21, %s4089_s13 }
0x437d   : > { %v3090_v17 = vadd.f32 %v3267_v29, %v3089_v54 }
0x437e   : > { %p4098_p8 = por %p4097_p7, %p4096_p4 }
0x437f   : > { %3124 = vrot.lane.b32.xlu1 %v2656_v16, %s4190_s22 }
0x4380   : > { %v3097_v25 = vpop.permute.xlu0 %3096  ;;  %p4099_p11 = pnand %p4098_p8, %p4092_p3 }
0x4383   : > { %3132 = vrot.lane.b32.xlu1 %v3090_v17, %s4191_s27 }
0x43bc   : > { %v3113_v30 = vpop.permute.xlu0 %3112 }
0x43c4   : > { %v3121_v1 = vpop.permute.xlu0 %3120 }
0x43d6   : > { %v2872_v18 = vpop.xlane.xlu1 %2871 }
0x43d7   : > { %v2873_v19 = vadd.f32 %v3267_v29, %v2872_v18 }
0x43d9   : > { %3128 = vrot.lane.b32.xlu0 %v2873_v19, %s4192_s30 }
0x43da   : > { %v3093_v37 = vpop.permute.xlu1 %3092 }
0x43db   : > { %v3136_v24 = vsel %vm3135_vm3, %v696_v41, %v3093_v37 }
0x43dc   : > { %v3138_v28 = vsel %vm3137_vm4, %v3136_v24, %v3097_v25 }
0x43de   : > { %v3101_v55 = vpop.permute.xlu1 %3100 }
0x43df   : > { %v3140_v22 = vsel %vm3139_vm5, %v3138_v28, %v3101_v55 }
0x43e2   : > { %v3105_v20 = vpop.permute.xlu1 %3104 }
0x43e3   : > { %v3142_v26 = vsel %vm3141_vm6, %v3140_v22, %v3105_v20 }
0x43e6   : > { %v3109_v21 = vpop.permute.xlu1 %3108 }
0x43e7   : > { %v3144_v2 = vsel %vm3143_vm7, %v3142_v26, %v3109_v21 }
0x43e8   : > { %v3146_v32 = vsel %vm3145_vm8, %v3144_v2, %v3113_v30 }
0x43ed   : > { %v3117_v10 = vpop.permute.xlu1 %3116 }
0x43ee   : > { %v3148_v7 = vsel %vm3147_vm9, %v3146_v32, %v3117_v10 }
0x43ef   : > { %v3150_v33 = vsel %vm3149_vm10, %v3148_v7, %v3121_v1 }
0x43f1   : > { %v3125_v23 = vpop.permute.xlu1 %3124 }
0x43f2   : > { %v3152_v34 = vsel %vm3151_vm11, %v3150_v33, %v3125_v23 }
0x43f5   : > { %v3133_v14 = vpop.permute.xlu1 %3132 }
0x444b   : > { %v3129_v35 = vpop.permute.xlu0 %3128 }
0x444c   : > { %v3154_v60 = vsel %vm3153_vm12, %v3152_v34, %v3129_v35 }
0x444d   : > { %v3156_v38 = vsel %vm3155_vm13, %v3154_v60, %v3133_v14 }
0x444e   : > { %3158 = vst.msk [vmem:[%s382_s23] sm:$0xff] %vm3157_vm14, %v3156_v38 }
0x444f   : > { %4102 = shalt.err (!%p4099_p11)
}
0x4450   : > { %s4103_s22 = scalar_lea.hbm %s4893_s12, 128  ;;  %s4107_s28 = scalar_lea.hbm %s4945_s10, 256 }
0x4451   : > { %p4104_p13 = scmp.ne.s32.totalorder %s4893_s12, %s4103_s22  ;;  %p4108_p6 = scmp.lt.u32.totalorder %s4893_s12, %s4945_s10 }
0x4452   : > { %p4109_p9 = scmp.lt.u32.totalorder %s4107_s28, %s4103_s22  ;;  %p4111_p10 = scmp.lt.u32.totalorder %s4103_s22, %s4893_s12 }
0x4453   : > { %p4105_p5 = pnand %p4104_p13, %p4964_p1 }
0x4454   : > { %p4110_p12 = por %p4109_p9, %p4108_p6 }
0x4455   : > { %p4106_p0 = pneg %p4105_p5 }
0x4456   : > { %p4112_p2 = por %p4111_p10, %p4110_p12 }
0x4458   : > { %p4113_p3 = pnand %p4112_p2, %p4106_p0 }
0x445a   : > { %4116 = shalt.err (!%p4113_p3)
}
0x445b   : > { %3749 = dma.vmem_to_hbm [thread:$0]  (%p4964_p1), %s4895_s26, 128, %s4893_s12, %s3160_s9  }
0x445c PF: > { %p3766_p4 = scmp.ge.s32.totalorder %s4159_s18, 2  ;;  %s3185_s23 = sand.u32 1, %s4147_s15  }
0x445d   : > { %p4965_p7 = scmp.ne.s32.totalorder %s4956_s25, 0  ;;  %s3186_s29 = scalar_lea.sflag [#allocation5], %s3185_s23 }
0x445f   : > { %p3759_p8 = pnand %p3766_p4, %p4965_p7 }
0x4461   : > { %4142 = dma.done.wait (!%p3759_p8), %s3186_s29, 128  }
0x4462   : > { %4144 = vsyncadd (!%p3759_p8), %s3186_s29, 4294967168  ;;  %s4966_s18 = sld [smem:[#allocation13_spill]]  ;;  %s4967_s11 = sld [smem:[#allocation12_spill]] }
0x4463   : > { %s4968_s17 = sld [smem:[#allocation14_spill]]  ;;  %s4969_s15 = smov %s4151_s16 }
0x4468   : > { %p24_p11 = scmp.ge.s32.totalorder %s4966_s18, 4   ;;  %s4970_s16 = smov %s4967_s11 }
0x446a   :  { %26 = sbr.rel (!%p24_p11) target bundleno = 8 (0x8), region = 104 }
0x4471   :  { %3191 = vsyncpa [#allocation4], 1 }
0x4472   :  { %3193 = vsyncpa [#allocation4 + $0x1], 1 }
0x4473   :  { %3194 = vsyncpa [#allocation7], 1 }
0x4474   :  { %3195 = vsyncpa [#allocation5], 1 }
0x4475   :  { %3197 = vsyncpa [#allocation5 + $0x1], 1 }

</bundles_post_ra>
